<compile_context>
chip_gen: v6e
topology: v6e:2x2x1
jax: 0.10.0
libtpu: 0.0.40
codegen_flags: <defaults>
</compile_context>

<pallas_src>
import functools

import jax
import jax.numpy as jnp
from jax import lax
from jax.experimental import pallas as pl
from jax.experimental.pallas import tpu as pltpu


def _round_up(n, m):
    return ((n + m - 1) // m) * m


def _sae_kernel(x_ref, we_ref, be_ref, wd_ref, sparse_ref, recon_ref,
                feat_scratch, *, k, compute_dtype):
    bm, hp = feat_scratch.shape

    # ----- encoder: ReLU(x @ W_enc.T + b_enc) -------------------------------
    # x_ref is already compute_dtype; we_ref is W_enc^T [Dp, Hp] so this is a
    # canonical [M,K]@[K,N] contraction on the MXU with f32 accumulation.
    feats = lax.dot_general(
        x_ref[...], we_ref[...],
        dimension_numbers=(((1,), (0,)), ((), ())),
        preferred_element_type=jnp.float32)
    feat_scratch[...] = jnp.maximum(feats + be_ref[...], 0.0)   # f32 [bm, Hp]

    # ----- exact per-row top-k, processed in 8-row sublane chunks -----------
    # Packed key: value bits (non-negative f32 -> order-preserving as int32)
    # with the low ceil(log2 Hp) bits replaced by (Hp-1-col). A single max
    # reduce per peel yields both the winning value's column (lowest index on
    # ties) and lets us retire it by writing key = -1 (< every valid key).
    low_bits = max((hp - 1).bit_length(), 1)
    low_mask = jnp.int32((1 << low_bits) - 1)
    high_mask = jnp.int32(-(1 << low_bits))              # == ~low_mask
    col = lax.broadcasted_iota(jnp.int32, (1, hp), 1)    # (1, Hp), broadcast
    idx_key = (hp - 1) - col                             # larger == lower col

    def peel(_, carry):
        keys, vals, sparse = carry
        kmax = jnp.max(keys, axis=-1, keepdims=True)     # single XLU reduce
        sel_col = (hp - 1) - (kmax & low_mask)           # recover column
        sel = col == sel_col                             # exactly one / row
        sparse = jnp.where(sel, vals, sparse)            # keep ORIGINAL value
        keys = jnp.where(sel, jnp.int32(-1), keys)       # retire the winner
        return keys, vals, sparse

    @pl.loop(0, bm // 8)
    def _(c):
        r = pl.multiple_of(c * 8, 8)
        vals = feat_scratch[pl.ds(r, 8), :]              # [8, Hp] f32, >= 0
        keys = (pltpu.bitcast(vals, jnp.int32) & high_mask) | idx_key
        carry = (keys, vals, jnp.zeros_like(vals))
        if k <= 16:                                      # small static k
            for _ in range(k):
                carry = peel(0, carry)
        else:                                            # bound code size
            carry = lax.fori_loop(0, k, peel, carry, unroll=4)
        feat_scratch[pl.ds(r, 8), :] = carry[2]          # overwrite with sparse

    # ----- decoder: sparse @ W_dec.T (no bias) ------------------------------
    # Feed the decoder from the f32 scratch (not the out_dtype output ref);
    # the output store is an independent write that can overlap the dot.
    sparse_f32 = feat_scratch[...]
    sparse_ref[...] = sparse_f32.astype(sparse_ref.dtype)
    recon = lax.dot_general(
        sparse_f32.astype(compute_dtype), wd_ref[...],   # [bm,Hp] @ [Hp,Dp]
        dimension_numbers=(((1,), (0,)), ((), ())),
        preferred_element_type=jnp.float32)
    recon_ref[...] = recon.astype(recon_ref.dtype)


def topk_sae_forward(x, w_enc, b_enc, w_dec, k, *, b_tile=128,
                     compute_dtype=None, interpret=False):
    """Fused TopK-SAE forward.

    x: [B, D], w_enc: [H, D], b_enc: [H], w_dec: [D, H].
    Returns (sparse_features [B, H], reconstruction [B, D]).

    compute_dtype: dtype fed to the MXU (accumulation stays f32). Passing
      jnp.bfloat16 halves weight DMA / VMEM and boosts MXU throughput on
      v5e, v6e and v7x alike (the top-k path stays f32 either way).
    b_tile: batch rows per grid step. 128 keeps grid length >= 2 at B >= 256
      so both v7x TensorCores stay busy; on single-TC parts (v5e/v6e) a larger
      tile (e.g. 256) trims per-step overhead.
    """
    B, D = x.shape
    H, D2 = w_enc.shape
    assert D2 == D and w_dec.shape == (D, H) and b_enc.shape == (H,)
    assert 0 <= k <= H, "k must satisfy 0 <= k <= hidden_dim"
    assert b_tile % 8 == 0, "batch tile must be a multiple of 8 (sublane)"

    if compute_dtype is None:
        compute_dtype = x.dtype
    out_dtype = x.dtype

    # Pad to lane/sublane friendly shapes. Zero padding is mathematically
    # inert: padded features are ReLU(0)=0 so they never displace positive
    # ones, and padded decoder rows/cols contribute nothing; pads are sliced
    # off on return.
    Dp = _round_up(D, 128)
    Hp = _round_up(H, 128)
    Bp = _round_up(max(B, b_tile), b_tile)

    # One-time layout plumbing OUTSIDE the kernel: cast to compute_dtype and
    # transpose weights so both in-kernel dots are canonical [M,K]@[K,N].
    x_p = jnp.pad(x.astype(compute_dtype), ((0, Bp - B), (0, Dp - D)))
    we_p = jnp.pad(w_enc.T.astype(compute_dtype), ((0, Dp - D), (0, Hp - H)))
    be_p = jnp.pad(b_enc.astype(jnp.float32), ((0, Hp - H),)).reshape(1, Hp)
    wd_p = jnp.pad(w_dec.T.astype(compute_dtype), ((0, Hp - H), (0, Dp - D)))

    grid = (Bp // b_tile,)

    elt = lambda dt: jnp.dtype(dt).itemsize
    cdt, odt = elt(compute_dtype), elt(out_dtype)

    # Explicit VMEM budget from the actual block footprint (weights are
    # single-buffered; x / outputs double-buffered; + f32 scratch), with 2x
    # headroom for compiler-internal scratch, floored at the default 32 MiB.
    weight_bytes = (we_p.size + wd_p.size) * cdt + be_p.size * 4
    block_bytes = (2 * b_tile * Dp * cdt          # x tile
                   + 2 * b_tile * Hp * odt        # sparse out tile
                   + 2 * b_tile * Dp * odt        # recon out tile
                   + b_tile * Hp * 4)             # f32 feats/sparse scratch
    vmem_limit = int(min(max(2 * (weight_bytes + block_bytes), 32 * 1024 * 1024),
                         128 * 1024 * 1024))

    cost = pl.CostEstimate(
        flops=2 * 2 * Bp * Dp * Hp,               # two matmuls
        transcendentals=0,
        bytes_accessed=(x_p.size * cdt + we_p.size * cdt + wd_p.size * cdt
                        + be_p.size * 4 + Bp * Hp * odt + Bp * Dp * odt),
    )

    weight_spec = lambda shape: pl.BlockSpec(shape, lambda i: (0, 0),
                                             pipeline_mode=pl.Buffered(1))

    kernel = functools.partial(_sae_kernel, k=int(k), compute_dtype=compute_dtype)
    sparse_p, recon_p = pl.pallas_call(
        kernel,
        out_shape=(jax.ShapeDtypeStruct((Bp, Hp), out_dtype),   # sparse feats
                   jax.ShapeDtypeStruct((Bp, Dp), out_dtype)),  # reconstruction
        grid=grid,
        in_specs=[
            pl.BlockSpec((b_tile, Dp), lambda i: (i, 0)),  # x batch tile
            weight_spec((Dp, Hp)),                         # W_enc^T (invariant)
            weight_spec((1, Hp)),                          # b_enc  (invariant)
            weight_spec((Hp, Dp)),                         # W_dec^T (invariant)
        ],
        out_specs=(
            pl.BlockSpec((b_tile, Hp), lambda i: (i, 0)),
            pl.BlockSpec((b_tile, Dp), lambda i: (i, 0)),
        ),
        scratch_shapes=[pltpu.VMEM((b_tile, Hp), jnp.float32)],
        compiler_params=pltpu.CompilerParams(
            dimension_semantics=("parallel",),
            vmem_limit_bytes=vmem_limit),
        cost_estimate=cost,
        interpret=interpret,
    )(x_p, we_p, be_p, wd_p)

    return sparse_p[:B, :H], recon_p[:B, :D]


def _verify(x, w_enc, b_enc, w_dec, k, sparse, recon, tol):
    """Check kernel outputs against plain-JAX math.

    Elementwise comparison against a separately-computed top-k is not
    meaningful when two float pipelines disagree on near-ties, so the defining
    properties are verified instead: kept values equal the true encoder
    features, at most k per row are kept, every kept value dominates every
    dropped value (up to tol), and the reconstruction equals the decoder
    applied to the kept features.
    """
    feats = jnp.maximum(
        jnp.einsum("bd,hd->bh", x, w_enc, precision=lax.Precision.HIGHEST)
        + b_enc, 0.0)
    mask = sparse != 0
    n_kept = jnp.sum(mask, axis=1)
    assert int(jnp.max(n_kept)) <= k, "kept more than k features"
    assert jnp.allclose(jnp.where(mask, feats, 0.0), sparse,
                        atol=tol, rtol=tol), "kept values wrong"
    kept_min = jnp.min(jnp.where(mask, feats, jnp.inf), axis=1)
    drop_max = jnp.max(jnp.where(mask, -jnp.inf, feats), axis=1)
    assert bool(jnp.all(kept_min + tol >= drop_max)), "top-k selection violated"
    assert bool(jnp.all((n_kept == k) | (drop_max <= tol))), \
        "kept fewer than k non-trivial features"
    recon_expected = jnp.einsum("bh,dh->bd", sparse, w_dec,
                                precision=lax.Precision.HIGHEST)
    assert jnp.allclose(recon, recon_expected, atol=tol, rtol=tol), \
        "reconstruction does not match decoder(sparse)"


if __name__ == "__main__":
    B, D_IN, HIDDEN, K = 256, 64, 256, 8

    key = jax.random.PRNGKey(0)
    kx, kw1, kb1, kw2 = jax.random.split(key, 4)

    # nn.Linear-style init: uniform(-1/sqrt(fan_in), 1/sqrt(fan_in)).
    lim_e = 1.0 / (D_IN ** 0.5)
    lim_d = 1.0 / (HIDDEN ** 0.5)
    w_enc = jax.random.uniform(kw1, (HIDDEN, D_IN), jnp.float32, -lim_e, lim_e)
    b_enc = jax.random.uniform(kb1, (HIDDEN,), jnp.float32, -lim_e, lim_e)
    w_dec = jax.random.uniform(kw2, (D_IN, HIDDEN), jnp.float32, -lim_d, lim_d)
    x = jax.random.normal(kx, (B, D_IN), jnp.float32)

    # f32 compute path (b_tile=128 -> grid length 2, both v7x TCs busy).
    sparse, recon = topk_sae_forward(x, w_enc, b_enc, w_dec, K, b_tile=128)
    jax.block_until_ready((sparse, recon))
    _verify(x, w_enc, b_enc, w_dec, K, sparse, recon, tol=1e-2)

    # bf16 MXU fast path (valid on v5e/v6e/v7x): same semantics, looser tol.
    sparse_bf, recon_bf = topk_sae_forward(
        x, w_enc, b_enc, w_dec, K, b_tile=128, compute_dtype=jnp.bfloat16)
    jax.block_until_ready((sparse_bf, recon_bf))
    _verify(x, w_enc, b_enc, w_dec, K, sparse_bf, recon_bf, tol=5e-2)

    print("KERNEL_OK")
</pallas_src>

<mosaic_0001>
module attributes {stable_mosaic.version = 11 : i64} {
  func.func @_sae_kernel(%arg0: i32, %arg1: memref<128x128xf32, #tpu.memory_space<vmem>>, %arg2: memref<128x256xf32, #tpu.memory_space<vmem>>, %arg3: memref<1x256xf32, #tpu.memory_space<vmem>>, %arg4: memref<256x128xf32, #tpu.memory_space<vmem>>, %arg5: memref<128x256xf32, #tpu.memory_space<vmem>>, %arg6: memref<128x128xf32, #tpu.memory_space<vmem>>, %arg7: memref<128x256xf32, #tpu.memory_space<vmem>>) attributes {dimension_semantics = [#tpu.dimension_semantics<parallel>], iteration_bounds = array<i64: 2>, scalar_prefetch = 0 : i64, scratch_operands = 1 : i64, tpu.core_type = #tpu.core_type<tc>, window_params = [{transform_indices = @transform_0, window_bounds = array<i64: 128, 128>}, {pipeline_mode = #tpu.pipeline_mode<synchronous>, transform_indices = @transform_1, window_bounds = array<i64: 128, 256>}, {pipeline_mode = #tpu.pipeline_mode<synchronous>, transform_indices = @transform_2, window_bounds = array<i64: 1, 256>}, {pipeline_mode = #tpu.pipeline_mode<synchronous>, transform_indices = @transform_3, window_bounds = array<i64: 256, 128>}, {transform_indices = @transform_4, window_bounds = array<i64: 128, 256>}, {transform_indices = @transform_5, window_bounds = array<i64: 128, 128>}]} {
    %c0 = arith.constant 0 : index
    %c0_0 = arith.constant 0 : index
    %0 = vector.load %arg1[%c0, %c0_0] : memref<128x128xf32, #tpu.memory_space<vmem>>, vector<128x128xf32>
    %c0_1 = arith.constant 0 : index
    %c0_2 = arith.constant 0 : index
    %1 = vector.load %arg2[%c0_1, %c0_2] : memref<128x256xf32, #tpu.memory_space<vmem>>, vector<128x256xf32>
    %cst = arith.constant dense<0.000000e+00> : vector<128x256xf32>
    %2 = tpu.matmul %0, %1, %cst {dimension_numbers = #tpu.dot_dimension_numbers<[1], [0], [0], [1], [0, 0, 1, 1], [], []>} : vector<128x128xf32>, vector<128x256xf32>, vector<128x256xf32> -> vector<128x256xf32>
    %c0_3 = arith.constant 0 : index
    %c0_4 = arith.constant 0 : index
    %3 = vector.load %arg3[%c0_3, %c0_4] : memref<1x256xf32, #tpu.memory_space<vmem>>, vector<1x256xf32>
    %4 = vector.broadcast %3 : vector<1x256xf32> to vector<128x256xf32>
    %5 = arith.addf %2, %4 : vector<128x256xf32>
    %cst_5 = arith.constant 0.000000e+00 : f32
    %6 = vector.broadcast %cst_5 : f32 to vector<128x256xf32>
    %7 = arith.maximumf %5, %6 : vector<128x256xf32>
    %c0_6 = arith.constant 0 : index
    %c0_7 = arith.constant 0 : index
    %8 = vector.load %arg7[%c0_6, %c0_7] : memref<128x256xf32, #tpu.memory_space<vmem>>, vector<128x256xf32>
    tpu.vector_store %arg7[%c0_6, %c0_7], %7 {strides = array<i32>} : memref<128x256xf32, #tpu.memory_space<vmem>>, vector<128x256xf32>,
    %9 = tpu.iota {dimensions = array<i32: 1>} : vector<1x256xi32>
    %c255_i32 = arith.constant 255 : i32
    %10 = vector.broadcast %c255_i32 : i32 to vector<1x256xi32>
    %11 = arith.subi %10, %9 : vector<1x256xi32>
    %c-256_i32 = arith.constant -256 : i32
    %c255_i32_8 = arith.constant 255 : i32
    %c0_i32 = arith.constant 0 : i32
    %c16_i32 = arith.constant 16 : i32
    %12 = arith.addi %c0_i32, %c16_i32 : i32
    %c1_i32 = arith.constant 1 : i32
    scf.for %arg8 = %c0_i32 to %12 step %c1_i32  : i32 {
      %c1_i32_19 = arith.constant 1 : i32
      %18 = arith.muli %arg8, %c1_i32_19 : i32
      %c0_i32_20 = arith.constant 0 : i32
      %19 = arith.addi %c0_i32_20, %18 : i32
      %c8_i32 = arith.constant 8 : i32
      %20 = arith.muli %19, %c8_i32 : i32
      %21 = tpu.assume_multiple %20, 8 : i32
      %22 = arith.index_cast %21 : i32 to index
      %c0_21 = arith.constant 0 : index
      %23 = vector.load %arg7[%22, %c0_21] : memref<128x256xf32, #tpu.memory_space<vmem>>, vector<8x256xf32>
      %24 = tpu.bitcast %23 : vector<8x256xf32> -> vector<8x256xi32>
      %25 = vector.broadcast %c-256_i32 : i32 to vector<8x256xi32>
      %26 = arith.andi %24, %25 : vector<8x256xi32>
      %27 = vector.broadcast %11 : vector<1x256xi32> to vector<8x256xi32>
      %28 = arith.ori %26, %27 : vector<8x256xi32>
      %cst_22 = arith.constant 0.000000e+00 : f32
      %29 = vector.broadcast %cst_22 : f32 to vector<8x256xf32>
      %cst_23 = arith.constant dense<-2147483648> : vector<8xi32>
      %30 = vector.multi_reduction <maxsi>, %28, %cst_23 [1] : vector<8x256xi32> to vector<8xi32>
      %31 = vector.shape_cast %30 : vector<8xi32> to vector<8x1xi32>
      %32 = vector.broadcast %c255_i32_8 : i32 to vector<8x1xi32>
      %33 = arith.andi %31, %32 : vector<8x1xi32>
      %c255_i32_24 = arith.constant 255 : i32
      %34 = vector.broadcast %c255_i32_24 : i32 to vector<8x1xi32>
      %35 = arith.subi %34, %33 : vector<8x1xi32>
      %36 = vector.broadcast %9 : vector<1x256xi32> to vector<8x256xi32>
      %37 = vector.broadcast %35 : vector<8x1xi32> to vector<8x256xi32>
      %38 = arith.cmpi eq, %36, %37 : vector<8x256xi32>
      %39 = arith.select %38, %23, %29 : vector<8x256xi1>, vector<8x256xf32>
      %c-1_i32 = arith.constant -1 : i32
      %40 = vector.broadcast %c-1_i32 : i32 to vector<8x256xi32>
      %41 = arith.select %38, %40, %28 : vector<8x256xi1>, vector<8x256xi32>
      %cst_25 = arith.constant dense<-2147483648> : vector<8xi32>
      %42 = vector.multi_reduction <maxsi>, %41, %cst_25 [1] : vector<8x256xi32> to vector<8xi32>
      %43 = vector.shape_cast %42 : vector<8xi32> to vector<8x1xi32>
      %44 = vector.broadcast %c255_i32_8 : i32 to vector<8x1xi32>
      %45 = arith.andi %43, %44 : vector<8x1xi32>
      %c255_i32_26 = arith.constant 255 : i32
      %46 = vector.broadcast %c255_i32_26 : i32 to vector<8x1xi32>
      %47 = arith.subi %46, %45 : vector<8x1xi32>
      %48 = vector.broadcast %9 : vector<1x256xi32> to vector<8x256xi32>
      %49 = vector.broadcast %47 : vector<8x1xi32> to vector<8x256xi32>
      %50 = arith.cmpi eq, %48, %49 : vector<8x256xi32>
      %51 = arith.select %50, %23, %39 : vector<8x256xi1>, vector<8x256xf32>
      %c-1_i32_27 = arith.constant -1 : i32
      %52 = vector.broadcast %c-1_i32_27 : i32 to vector<8x256xi32>
      %53 = arith.select %50, %52, %41 : vector<8x256xi1>, vector<8x256xi32>
      %cst_28 = arith.constant dense<-2147483648> : vector<8xi32>
      %54 = vector.multi_reduction <maxsi>, %53, %cst_28 [1] : vector<8x256xi32> to vector<8xi32>
      %55 = vector.shape_cast %54 : vector<8xi32> to vector<8x1xi32>
      %56 = vector.broadcast %c255_i32_8 : i32 to vector<8x1xi32>
      %57 = arith.andi %55, %56 : vector<8x1xi32>
      %c255_i32_29 = arith.constant 255 : i32
      %58 = vector.broadcast %c255_i32_29 : i32 to vector<8x1xi32>
      %59 = arith.subi %58, %57 : vector<8x1xi32>
      %60 = vector.broadcast %9 : vector<1x256xi32> to vector<8x256xi32>
      %61 = vector.broadcast %59 : vector<8x1xi32> to vector<8x256xi32>
      %62 = arith.cmpi eq, %60, %61 : vector<8x256xi32>
      %63 = arith.select %62, %23, %51 : vector<8x256xi1>, vector<8x256xf32>
      %c-1_i32_30 = arith.constant -1 : i32
      %64 = vector.broadcast %c-1_i32_30 : i32 to vector<8x256xi32>
      %65 = arith.select %62, %64, %53 : vector<8x256xi1>, vector<8x256xi32>
      %cst_31 = arith.constant dense<-2147483648> : vector<8xi32>
      %66 = vector.multi_reduction <maxsi>, %65, %cst_31 [1] : vector<8x256xi32> to vector<8xi32>
      %67 = vector.shape_cast %66 : vector<8xi32> to vector<8x1xi32>
      %68 = vector.broadcast %c255_i32_8 : i32 to vector<8x1xi32>
      %69 = arith.andi %67, %68 : vector<8x1xi32>
      %c255_i32_32 = arith.constant 255 : i32
      %70 = vector.broadcast %c255_i32_32 : i32 to vector<8x1xi32>
      %71 = arith.subi %70, %69 : vector<8x1xi32>
      %72 = vector.broadcast %9 : vector<1x256xi32> to vector<8x256xi32>
      %73 = vector.broadcast %71 : vector<8x1xi32> to vector<8x256xi32>
      %74 = arith.cmpi eq, %72, %73 : vector<8x256xi32>
      %75 = arith.select %74, %23, %63 : vector<8x256xi1>, vector<8x256xf32>
      %c-1_i32_33 = arith.constant -1 : i32
      %76 = vector.broadcast %c-1_i32_33 : i32 to vector<8x256xi32>
      %77 = arith.select %74, %76, %65 : vector<8x256xi1>, vector<8x256xi32>
      %cst_34 = arith.constant dense<-2147483648> : vector<8xi32>
      %78 = vector.multi_reduction <maxsi>, %77, %cst_34 [1] : vector<8x256xi32> to vector<8xi32>
      %79 = vector.shape_cast %78 : vector<8xi32> to vector<8x1xi32>
      %80 = vector.broadcast %c255_i32_8 : i32 to vector<8x1xi32>
      %81 = arith.andi %79, %80 : vector<8x1xi32>
      %c255_i32_35 = arith.constant 255 : i32
      %82 = vector.broadcast %c255_i32_35 : i32 to vector<8x1xi32>
      %83 = arith.subi %82, %81 : vector<8x1xi32>
      %84 = vector.broadcast %9 : vector<1x256xi32> to vector<8x256xi32>
      %85 = vector.broadcast %83 : vector<8x1xi32> to vector<8x256xi32>
      %86 = arith.cmpi eq, %84, %85 : vector<8x256xi32>
      %87 = arith.select %86, %23, %75 : vector<8x256xi1>, vector<8x256xf32>
      %c-1_i32_36 = arith.constant -1 : i32
      %88 = vector.broadcast %c-1_i32_36 : i32 to vector<8x256xi32>
      %89 = arith.select %86, %88, %77 : vector<8x256xi1>, vector<8x256xi32>
      %cst_37 = arith.constant dense<-2147483648> : vector<8xi32>
      %90 = vector.multi_reduction <maxsi>, %89, %cst_37 [1] : vector<8x256xi32> to vector<8xi32>
      %91 = vector.shape_cast %90 : vector<8xi32> to vector<8x1xi32>
      %92 = vector.broadcast %c255_i32_8 : i32 to vector<8x1xi32>
      %93 = arith.andi %91, %92 : vector<8x1xi32>
      %c255_i32_38 = arith.constant 255 : i32
      %94 = vector.broadcast %c255_i32_38 : i32 to vector<8x1xi32>
      %95 = arith.subi %94, %93 : vector<8x1xi32>
      %96 = vector.broadcast %9 : vector<1x256xi32> to vector<8x256xi32>
      %97 = vector.broadcast %95 : vector<8x1xi32> to vector<8x256xi32>
      %98 = arith.cmpi eq, %96, %97 : vector<8x256xi32>
      %99 = arith.select %98, %23, %87 : vector<8x256xi1>, vector<8x256xf32>
      %c-1_i32_39 = arith.constant -1 : i32
      %100 = vector.broadcast %c-1_i32_39 : i32 to vector<8x256xi32>
      %101 = arith.select %98, %100, %89 : vector<8x256xi1>, vector<8x256xi32>
      %cst_40 = arith.constant dense<-2147483648> : vector<8xi32>
      %102 = vector.multi_reduction <maxsi>, %101, %cst_40 [1] : vector<8x256xi32> to vector<8xi32>
      %103 = vector.shape_cast %102 : vector<8xi32> to vector<8x1xi32>
      %104 = vector.broadcast %c255_i32_8 : i32 to vector<8x1xi32>
      %105 = arith.andi %103, %104 : vector<8x1xi32>
      %c255_i32_41 = arith.constant 255 : i32
      %106 = vector.broadcast %c255_i32_41 : i32 to vector<8x1xi32>
      %107 = arith.subi %106, %105 : vector<8x1xi32>
      %108 = vector.broadcast %9 : vector<1x256xi32> to vector<8x256xi32>
      %109 = vector.broadcast %107 : vector<8x1xi32> to vector<8x256xi32>
      %110 = arith.cmpi eq, %108, %109 : vector<8x256xi32>
      %111 = arith.select %110, %23, %99 : vector<8x256xi1>, vector<8x256xf32>
      %c-1_i32_42 = arith.constant -1 : i32
      %112 = vector.broadcast %c-1_i32_42 : i32 to vector<8x256xi32>
      %113 = arith.select %110, %112, %101 : vector<8x256xi1>, vector<8x256xi32>
      %cst_43 = arith.constant dense<-2147483648> : vector<8xi32>
      %114 = vector.multi_reduction <maxsi>, %113, %cst_43 [1] : vector<8x256xi32> to vector<8xi32>
      %115 = vector.shape_cast %114 : vector<8xi32> to vector<8x1xi32>
      %116 = vector.broadcast %c255_i32_8 : i32 to vector<8x1xi32>
      %117 = arith.andi %115, %116 : vector<8x1xi32>
      %c255_i32_44 = arith.constant 255 : i32
      %118 = vector.broadcast %c255_i32_44 : i32 to vector<8x1xi32>
      %119 = arith.subi %118, %117 : vector<8x1xi32>
      %120 = vector.broadcast %9 : vector<1x256xi32> to vector<8x256xi32>
      %121 = vector.broadcast %119 : vector<8x1xi32> to vector<8x256xi32>
      %122 = arith.cmpi eq, %120, %121 : vector<8x256xi32>
      %123 = arith.select %122, %23, %111 : vector<8x256xi1>, vector<8x256xf32>
      %124 = arith.index_cast %21 : i32 to index
      %c0_45 = arith.constant 0 : index
      %125 = vector.load %arg7[%124, %c0_45] : memref<128x256xf32, #tpu.memory_space<vmem>>, vector<8x256xf32>
      tpu.vector_store %arg7[%124, %c0_45], %123 {strides = array<i32>} : memref<128x256xf32, #tpu.memory_space<vmem>>, vector<8x256xf32>,
    }
    %c16_i32_9 = arith.constant 16 : i32
    %c0_10 = arith.constant 0 : index
    %c0_11 = arith.constant 0 : index
    %13 = vector.load %arg7[%c0_10, %c0_11] : memref<128x256xf32, #tpu.memory_space<vmem>>, vector<128x256xf32>
    %c0_12 = arith.constant 0 : index
    %c0_13 = arith.constant 0 : index
    %14 = vector.load %arg5[%c0_12, %c0_13] : memref<128x256xf32, #tpu.memory_space<vmem>>, vector<128x256xf32>
    tpu.vector_store %arg5[%c0_12, %c0_13], %13 {strides = array<i32>} : memref<128x256xf32, #tpu.memory_space<vmem>>, vector<128x256xf32>,
    %c0_14 = arith.constant 0 : index
    %c0_15 = arith.constant 0 : index
    %15 = vector.load %arg4[%c0_14, %c0_15] : memref<256x128xf32, #tpu.memory_space<vmem>>, vector<256x128xf32>
    %cst_16 = arith.constant dense<0.000000e+00> : vector<128x128xf32>
    %16 = tpu.matmul %13, %15, %cst_16 {dimension_numbers = #tpu.dot_dimension_numbers<[1], [0], [0], [1], [0, 0, 1, 1], [], []>} : vector<128x256xf32>, vector<256x128xf32>, vector<128x128xf32> -> vector<128x128xf32>
    %c0_17 = arith.constant 0 : index
    %c0_18 = arith.constant 0 : index
    %17 = vector.load %arg6[%c0_17, %c0_18] : memref<128x128xf32, #tpu.memory_space<vmem>>, vector<128x128xf32>
    tpu.vector_store %arg6[%c0_17, %c0_18], %16 {strides = array<i32>} : memref<128x128xf32, #tpu.memory_space<vmem>>, vector<128x128xf32>,
    return
  }
  func.func @transform_0(%arg0: i32) -> (i32, i32) {
    %c0_i32 = arith.constant 0 : i32
    %c0_i32_0 = arith.constant 0 : i32
    return %arg0, %c0_i32 : i32, i32
  }
  func.func @transform_1(%arg0: i32) -> (i32, i32) {
    %c0_i32 = arith.constant 0 : i32
    %c0_i32_0 = arith.constant 0 : i32
    %c0_i32_1 = arith.constant 0 : i32
    return %c0_i32, %c0_i32_0 : i32, i32
  }
  func.func @transform_2(%arg0: i32) -> (i32, i32) {
    %c0_i32 = arith.constant 0 : i32
    %c0_i32_0 = arith.constant 0 : i32
    %c0_i32_1 = arith.constant 0 : i32
    return %c0_i32, %c0_i32_0 : i32, i32
  }
  func.func @transform_3(%arg0: i32) -> (i32, i32) {
    %c0_i32 = arith.constant 0 : i32
    %c0_i32_0 = arith.constant 0 : i32
    %c0_i32_1 = arith.constant 0 : i32
    return %c0_i32, %c0_i32_0 : i32, i32
  }
  func.func @transform_4(%arg0: i32) -> (i32, i32) {
    %c0_i32 = arith.constant 0 : i32
    %c0_i32_0 = arith.constant 0 : i32
    return %arg0, %c0_i32 : i32, i32
  }
  func.func @transform_5(%arg0: i32) -> (i32, i32) {
    %c0_i32 = arith.constant 0 : i32
    %c0_i32_0 = arith.constant 0 : i32
    return %arg0, %c0_i32 : i32, i32
  }
}

</mosaic_0001>

<bundles_post_ra>
// kernel: tpu_custom_call.1
= control target key start
LH: loop header
LB: loop body
LE: loop exit
PB: predicated region body
PF: predicated region fallthrough
CT: control target
= control target key end

     0   :  { %11 = vsyncpa [#allocation4], 0  ;;  %s2171_s0 = inlined_call_operand.hbm [shape: f32[256,128], index: 0, kind: input, shape index: {}]   ;;  %s2172_s1 = inlined_call_operand.hbm [shape: f32[128,256], index: 1, kind: input, shape index: {}]   ;;  %s2173_s2 = inlined_call_operand.vmem [shape: f32[1,256], index: 2, kind: input, shape index: {}]   ;;  %s2174_s3 = inlined_call_operand.hbm [shape: f32[256,128], index: 3, kind: input, shape index: {}]   ;;  %s2175_s4 = inlined_call_operand.hbm [shape: f32[256,256], index: 4, kind: output, shape index: {0}]   ;;  %s2176_s5 = inlined_call_operand.hbm [shape: f32[256,128], index: 5, kind: output, shape index: {1}]  }
   0x1   :  { %13 = vsyncpa [#allocation4 + $0x1], 0 }
   0x2   :  { %14 = vsyncpa [#allocation7], 0 }
   0x3   :  { %15 = vsyncpa [#allocation5], 0 }
   0x4   :  { %17 = vsyncpa [#allocation5 + $0x1], 0 }
   0x5   :  { %18 = vsyncpa [#allocation11], 0 }
   0x6   :  { %20 = vsyncpa [#allocation11 + $0x1], 0  ;;  %s1644_s18 = smov 0   ;;  %s1646_s19 = smov 0  }
   0x7   :  { %s1648_s20 = smov 0   ;;  %s1650_s21 = smov 0  }
   0x8 LB: > { %s1665_s22 = sadd.s32 4294967295, %s1594_s21   ;;  %s1212_s23 = sadd.s32 4294967294, %s1594_s21   ;;  %s1594_s21 = sphi %s1650_s21, %s2200_s21   ;;  %s1590_s20 = sphi %s1648_s20, %s2199_s20   ;;  %s1586_s19 = sphi %s1646_s19, %s2198_s19   ;;  %s1582_s18 = sphi %s1644_s18, %s2197_s18  }
   0x9   : > { %p46_p0 = scmp.ne.s32.totalorder %s1586_s19, %s1582_s18  ;;  %p2177_p1 = scmp.eq.s32.totalorder %s1665_s22, 0 }
   0xa   : > { %p139_p3 = scmp.eq.s32.totalorder %s1212_s23, 1  ;;  %p1213_p5 = scmp.ge.s32.totalorder %s1594_s21, 1 }
   0xb   : > { %p1674_p4 = por %p2177_p1, %p46_p0  ;;  %p172_p7 = scmp.lt.s32.totalorder %s1594_s21, 3 }
   0xc   : > { %p1679_p6 = por %p139_p3, %p46_p0  ;;  %s1600_s27 = smov [#allocation6]  }
   0xd   : > { %s2182_s24 = scalar_select %p1674_p4, 1, 0 }
   0xe   : > { %s2183_s25 = scalar_select %p1679_p6, 1, 0 }
   0xf   : > { %p1684_p8 = pnand %p1213_p5, %p172_p7  ;;  %s184_s28 = sshll.u32 %s1600_s27, 4  ;;  %s185_s28 = int_to_ptr.vmem [resolvable:$true] %s184_s28 }
  0x10   : > { %s1601_s30 = smov [#allocation8]   ;;  %s1423_s7 = scalar_lea.vmem %s185_s28, 4096 }
  0x11   : > { %s2184_s26 = scalar_select %p1684_p8, 1, 0 }
  0x12   : > { %p1337_p9 = pneg %p1684_p8  ;;  %s200_s6 = sshll.u32 %s1601_s30, 4  ;;  %s201_s6 = int_to_ptr.vmem [resolvable:$true] %s200_s6 }
  0x13   : > { %p1424_p13 = scmp.ne.s32.totalorder %s185_s28, %s1423_s7  ;;  %p1431_p5 = scmp.lt.s32.totalorder %s185_s28, %s185_s28 }
  0x14   : > { %p1693_p11 = pnand %p1337_p9, %p2177_p1  ;;  %p1432_p7 = scmp.lt.s32.totalorder %s1423_s7, %s1423_s7 }
  0x16   : > { %p1414_p12 = pneg %p1693_p11  ;;  %p1433_p10 = por %p1432_p7, %p1431_p5 }
  0x18   : > { %p1426_p0 = pnand %p1424_p13, %p1414_p12 }
  0x1a   : > { %p1427_p3 = pneg %p1426_p0 }
  0x1c   : > { %p1434_p9 = pnand %p1433_p10, %p1427_p3 }
  0x1e   : > { %1437 = shalt.err (!%p1434_p9)
}
  0x1f   : > { %s1602_s8 = smov 256   ;;  %s1603_s9 = smov 16  }
  0x20   : > { %1340 = dma.hbm_to_vmem [thread:$0]  (!%p1693_p11), %s2172_s1, 4096, %s185_s28, [#allocation7], %s1602_s8, %s1602_s8, %s1603_s9  }
  0x21   : > { %s1449_s12 = scalar_lea.vmem %s201_s6, 4096  ;;  %p1457_p2 = scmp.lt.s32.totalorder %s201_s6, %s201_s6 }
  0x22   : > { %p1450_p1 = scmp.ne.s32.totalorder %s201_s6, %s1449_s12  ;;  %p1458_p6 = scmp.lt.s32.totalorder %s1449_s12, %s1449_s12 }
  0x24   : > { %p1452_p13 = pnand %p1450_p1, %p1414_p12  ;;  %p1459_p5 = por %p1458_p6, %p1457_p2 }
  0x26   : > { %p1453_p0 = pneg %p1452_p13 }
  0x28   : > { %p1460_p10 = pnand %p1459_p5, %p1453_p0 }
  0x2a   : > { %1463 = shalt.err (!%p1460_p10)
}
  0x2b   : > { %s2178_s13 = smov 128   ;;  %s1605_s14 = smov 8  }
  0x2c   : > { %1343 = dma.hbm_to_vmem [thread:$0]  (!%p1693_p11), %s2174_s3, 4096, %s201_s6, [#allocation7], %s2178_s13, %s2178_s13, %s1605_s14  }
  0x2d   : > { %s1719_s17 = sadd.s32 1, %s1594_s21   ;;  %s33_s27 = sadd.s32 1, %s1590_s20 }
  0x2e   : > { %s30_s23 = ssub.s32 %s1594_s21, %s1719_s17  ;;  %p40_p2 = scmp.ne.s32.totalorder %s1590_s20, %s1586_s19 }
  0x2f   : > { %p31_p1 = scmp.eq.s32.totalorder %s30_s23, 0  ;;  %p41_p6 = scmp.eq.s32.totalorder %s1594_s21, 0 }
  0x30   : > { %p2186_p3 = scmp.eq.s32.totalorder %s1665_s22, 1  ;;  %p1357_p9 = scmp.lt.s32.totalorder %s1594_s21, 2 }
  0x31   : > { %s1728_s28 = scalar_select %p31_p1, %s1590_s20, %s33_s27  }
  0x32   : > { %p42_p12 = por %p41_p6, %p40_p2  ;;  %p1732_p7 = por %p2186_p3, %p40_p2 }
  0x33   : > { %s214_s30 = sand.u32 1, %s1590_s20   ;;  %s1238_s6 = sshll.u32 %s1594_s21, 11 }
  0x34   : > { %s2187_s29 = scalar_select %p1732_p7, 1, 0 }
  0x35   : > { %s1217_s7 = sshll.u32 %s214_s30, 7  ;;  %s1742_s10 = scalar_lea.hbm %s2171_s0, %s1238_s6 }
  0x36   : > { %s218_s11 = scalar_lea.vmem [#allocation3], %s1217_s7  ;;  %p1746_p11 = pnand %p1357_p9, %p42_p12 }
  0x37   : > { %s225_s12 = sshll.u32 %s218_s11, 4  ;;  %s1750_s16 = scalar_lea.sflag [#allocation4], %s214_s30  ;;  %s1744_s12 = int_to_ptr.vmem [resolvable:$true] %s225_s12 }
  0x38   : > { %s1464_s23 = scalar_lea.hbm %s1742_s10, 2048  ;;  %p1466_p0 = pneg %p1746_p11 }
  0x39   : > { %p1465_p13 = scmp.ne.s32.totalorder %s1742_s10, %s1464_s23  ;;  %s1469_s7 = scalar_lea.hbm %s2171_s0, 4096 }
  0x3a   : > { %p1470_p1 = scmp.lt.s32.totalorder %s1742_s10, %s2171_s0  ;;  %p1471_p2 = scmp.lt.s32.totalorder %s1469_s7, %s1464_s23 }
  0x3b   : > { %p1467_p5 = pnand %p1466_p0, %p1465_p13 }
  0x3c   : > { %p1472_p6 = por %p1471_p2, %p1470_p1 }
  0x3d   : > { %p1468_p10 = pneg %p1467_p5 }
  0x3f   : > { %p1473_p12 = pnand %p1472_p6, %p1468_p10 }
  0x41   : > { %1476 = shalt.err (!%p1473_p12)
}
  0x42   : > { %s1477_s30 = scalar_lea.vmem %s1744_s12, 2048  ;;  %s1606_s11 = smov [#allocation3]  }
  0x43   : > { %p1478_p3 = scmp.ne.s32.totalorder %s1744_s12, %s1477_s30  ;;  %s1482_s13 = sshll.u32 %s1606_s11, 4  ;;  %s1483_s13 = int_to_ptr.vmem [resolvable:$false] %s1482_s13 }
  0x44   : > { %s1484_s27 = scalar_lea.vmem %s1483_s13, 4096  ;;  %p1485_p5 = scmp.lt.s32.totalorder %s1744_s12, %s1483_s13 }
  0x45   : > { %p1480_p9 = pnand %p1478_p3, %p1466_p0  ;;  %p1486_p7 = scmp.lt.s32.totalorder %s1484_s27, %s1477_s30 }
  0x47   : > { %p1481_p13 = pneg %p1480_p9  ;;  %p1487_p4 = por %p1486_p7, %p1485_p5 }
  0x49   : > { %p1488_p8 = pnand %p1487_p4, %p1481_p13 }
  0x4b   : > { %1491 = shalt.err (!%p1488_p8)
}
  0x4c   : > { %s2189_s23 = smov 128   ;;  %p2190_p0 = scmp.ne.s32.totalorder %s2184_s26, 0 }
  0x4d   : > { %1347 = dma.hbm_to_vmem [thread:$0]  (!%p1746_p11), %s1742_s10, 2048, %s1744_s12, %s1750_s16, %s2189_s23, %s2189_s23, %s1605_s14  }
  0x4e   : > { %237 = sbr.rel (%p2190_p0) target bundleno = 3040 (0xbe0), region = 36  ;;  %s1777_s6 = sand.u32 (!%p2190_p0), 1, %s1586_s19  }
  0x4f   : > { %s1221_s13 = sshll.u32 (!%p2190_p0), %s1777_s6, 7  ;;  %s240_s7 = scalar_lea.sflag (!%p2190_p0), [#allocation4], %s1777_s6 }
  0x50   : > { %s1783_s15 = scalar_lea.vmem (!%p2190_p0), [#allocation3], %s1221_s13  ;;  %p2191_p4 = scmp.ne.s32.totalorder (!%p2190_p0), %s2182_s24, 0 }
  0x53   : > { %1565 = dma.done.wait (%p2191_p4), %s240_s7, 2048  }
  0x54   : > { %1567 = vsyncadd (%p2191_p4), %s240_s7, 4294965248  ;;  %p2192_p8 = scmp.eq.s32.totalorder %s1665_s22, 0 }
  0x56   : > { %1569 = dma.done.wait (%p2192_p8), [#allocation7], 8192   ;;  %p2193_p7 = pmov %p2192_p8 }
  0x57   : > { %s1224_s26 = sshll.u32 %s1777_s6, 8  ;;  %v1607_v0 = vmov 0.0   ;;  %v333_v1 = vld [vmem:[#allocation6 + $0xf8] sm:$0xff]  ;;  %v332_v2 = vld [vmem:[#allocation6 + $0xf0] sm:$0xff]  ;;  %v331_v3 = vld [vmem:[#allocation6 + $0xe8] sm:$0xff]  ;;  %v336_v49 = vlaneseq  ;;  %s1878_s12 = scalar_lea.vmem [#allocation10], %s1221_s13 }
  0x58   : > { %1571 = vsyncadd (%p2193_p7), [#allocation7], 4294959104  ;;  %410 = vmatprep.mubr.f32.mxu0 %v1607_v0  ;;  %346 = vmatprep.subr.mxu0 %v333_v1  ;;  %v330_v4 = vld [vmem:[#allocation6 + $0xe0] sm:$0xff]  ;;  %v329_v5 = vld [vmem:[#allocation6 + $0xd8] sm:$0xff]  ;;  %s1874_s10 = scalar_lea.vmem [#allocation9], %s1224_s26  ;;  %s1880_s16 = smov 0  }
  0x59   : > { %347 = vmatpush1.msra.mxu0 %v332_v2  ;;  %v328_v6 = vld [vmem:[#allocation6 + $0xd0] sm:$0xff]  ;;  %v327_v7 = vld [vmem:[#allocation6 + $0xc8] sm:$0xff]  ;;  %v326_v8 = vld [vmem:[#allocation6 + $0xc0] sm:$0xff]  ;;  %v1826_v50 = vand.u32 127, %v336_v49  ;;  %v337_v54 = vshrl.u32 %v336_v49, 7 }
  0x5a   : > { %348 = vmatprep.subr.mxu0 %v331_v3  ;;  %v325_v9 = vld [vmem:[#allocation6 + $0xb8] sm:$0xff]  ;;  %v324_v10 = vld [vmem:[#allocation6 + $0xb0] sm:$0xff]  ;;  %v323_v11 = vld [vmem:[#allocation6 + $0xa8] sm:$0xff] }
  0x5b   : > { %349 = vmatpush1.msra.mxu0 %v330_v4  ;;  %v322_v12 = vld [vmem:[#allocation6 + $0xa0] sm:$0xff]  ;;  %v321_v13 = vld [vmem:[#allocation6 + $0x98] sm:$0xff]  ;;  %v320_v14 = vld [vmem:[#allocation6 + $0x90] sm:$0xff]  ;;  %v1829_v51 = vadd.s32 128, %v1826_v50  ;;  %v574_v52 = vsub.s32 255, %v1826_v50  ;;  %v338_v55 = vsub.s32 0, %v337_v54 }
  0x5c   : > { %350 = vmatprep.subr.mxu0 %v329_v5  ;;  %v319_v15 = vld [vmem:[#allocation6 + $0x88] sm:$0xff]  ;;  %v318_v16 = vld [vmem:[#allocation6 + $0x80] sm:$0xff]  ;;  %v317_v17 = vld [vmem:[#allocation6 + $0x78] sm:$0xff]  ;;  %v342_v57 = vsub.s32 1, %v337_v54 }
  0x5d   : > { %351 = vmatpush1.msra.mxu0 %v328_v6  ;;  %v316_v18 = vld [vmem:[#allocation6 + $0x70] sm:$0xff]  ;;  %v315_v19 = vld [vmem:[#allocation6 + $0x68] sm:$0xff]  ;;  %v314_v20 = vld [vmem:[#allocation6 + $0x60] sm:$0xff]  ;;  %v575_v53 = vsub.s32 255, %v1829_v51 }
  0x5e   : > { %352 = vmatprep.subr.mxu0 %v327_v7  ;;  %v313_v21 = vld [vmem:[#allocation6 + $0x58] sm:$0xff]  ;;  %v312_v22 = vld [vmem:[#allocation6 + $0x50] sm:$0xff]  ;;  %v311_v23 = vld [vmem:[#allocation6 + $0x48] sm:$0xff] }
  0x5f   : > { %353 = vmatpush1.msra.mxu0 %v326_v8  ;;  %v310_v24 = vld [vmem:[#allocation6 + $0x40] sm:$0xff]  ;;  %v309_v25 = vld [vmem:[#allocation6 + $0x38] sm:$0xff]  ;;  %v308_v26 = vld [vmem:[#allocation6 + $0x30] sm:$0xff] }
  0x60   : > { %354 = vmatprep.subr.mxu0 %v325_v9  ;;  %v307_v27 = vld [vmem:[#allocation6 + $0x28] sm:$0xff]  ;;  %v306_v28 = vld [vmem:[#allocation6 + $0x20] sm:$0xff]  ;;  %v305_v29 = vld [vmem:[#allocation6 + $0x18] sm:$0xff] }
  0x61   : > { %355 = vmatpush1.msra.mxu0 %v324_v10  ;;  %v304_v30 = vld [vmem:[#allocation6 + $0x10] sm:$0xff]  ;;  %v303_v31 = vld [vmem:[#allocation6 + $0x8] sm:$0xff]  ;;  %v302_v32 = vld [vmem:[#allocation6] sm:$0xff] }
  0x62   : > { %356 = vmatprep.subr.mxu0 %v323_v11  ;;  %v286_v33 = vld [vmem:[%s1783_s15] sm:$0xff]  ;;  %v287_v34 = vld [vmem:[%s1783_s15 + $0x8] sm:$0xff]  ;;  %v288_v35 = vld [vmem:[%s1783_s15 + $0x10] sm:$0xff] }
  0x63   : > { %357 = vmatpush1.msra.mxu0 %v322_v12  ;;  %v289_v36 = vld [vmem:[%s1783_s15 + $0x18] sm:$0xff]  ;;  %v290_v37 = vld [vmem:[%s1783_s15 + $0x20] sm:$0xff]  ;;  %v291_v38 = vld [vmem:[%s1783_s15 + $0x28] sm:$0xff] }
  0x64   : > { %358 = vmatprep.subr.mxu0 %v321_v13  ;;  %v292_v39 = vld [vmem:[%s1783_s15 + $0x30] sm:$0xff]  ;;  %v293_v40 = vld [vmem:[%s1783_s15 + $0x38] sm:$0xff]  ;;  %v294_v41 = vld [vmem:[%s1783_s15 + $0x40] sm:$0xff] }
  0x65   : > { %359 = vmatpush1.msra.mxu0 %v320_v14  ;;  %v295_v42 = vld [vmem:[%s1783_s15 + $0x48] sm:$0xff]  ;;  %v296_v43 = vld [vmem:[%s1783_s15 + $0x50] sm:$0xff]  ;;  %v297_v44 = vld [vmem:[%s1783_s15 + $0x58] sm:$0xff] }
  0x66   : > { %360 = vmatprep.subr.mxu0 %v319_v15  ;;  %v298_v45 = vld [vmem:[%s1783_s15 + $0x60] sm:$0xff]  ;;  %v299_v46 = vld [vmem:[%s1783_s15 + $0x68] sm:$0xff]  ;;  %v300_v47 = vld [vmem:[%s1783_s15 + $0x70] sm:$0xff] }
  0x67   : > { %361 = vmatpush1.msra.mxu0 %v318_v16  ;;  %v301_v48 = vld [vmem:[%s1783_s15 + $0x78] sm:$0xff]  ;;  %v334_v56 = vld [vmem:[%s2173_s2] sm:$0x3] }
  0x68   : > { %362 = vmatprep.subr.mxu0 %v317_v17  ;;  %v1836_v58 = vrot.slane %v334_v56, %v338_v55  ;;  %v1838_v59 = vrot.slane %v334_v56, %v342_v57 }
  0x69   : > { %363 = vmatpush1.msra.mxu0 %v316_v18 }
  0x6a   : > { %364 = vmatprep.subr.mxu0 %v315_v19 }
  0x6b   : > { %365 = vmatpush1.msra.mxu0 %v314_v20 }
  0x6c   : > { %366 = vmatprep.subr.mxu0 %v313_v21 }
  0x6d   : > { %367 = vmatpush1.msra.mxu0 %v312_v22 }
  0x6e   : > { %368 = vmatprep.subr.mxu0 %v311_v23 }
  0x6f   : > { %369 = vmatpush1.msra.mxu0 %v310_v24 }
  0x70   : > { %370 = vmatprep.subr.mxu0 %v309_v25 }
  0x71   : > { %371 = vmatpush1.msra.mxu0 %v308_v26 }
  0x72   : > { %372 = vmatprep.subr.mxu0 %v307_v27 }
  0x73   : > { %373 = vmatpush1.msra.mxu0 %v306_v28 }
  0x74   : > { %374 = vmatprep.subr.mxu0 %v305_v29 }
  0x75   : > { %375 = vmatpush1.msra.mxu0 %v304_v30 }
  0x76   : > { %376 = vmatprep.subr.mxu0 %v303_v31 }
  0x77   : > { %377 = vmatpush1.msra.mxu0 %v302_v32 }
  0x78   : > { %411 = vmatmul.mubr.f32.vlgmr.msra.gmra.mxu0 %v286_v33 }
  0x79   : > { %416 = vmatprep.mubr.f32.mxu0 %v1607_v0 }
  0x7c   : > { %417 = vmatmul.mubr.f32.gmra.mxu0 %v287_v34 }
  0x7d   : > { %422 = vmatprep.mubr.f32.mxu0 %v1607_v0 }
  0x80   : > { %423 = vmatmul.mubr.f32.gmra.mxu0 %v288_v35 }
  0x81   : > { %428 = vmatprep.mubr.f32.mxu0 %v1607_v0 }
  0x84   : > { %429 = vmatmul.mubr.f32.gmra.mxu0 %v289_v36 }
  0x85   : > { %434 = vmatprep.mubr.f32.mxu0 %v1607_v0 }
  0x88   : > { %435 = vmatmul.mubr.f32.gmra.mxu0 %v290_v37 }
  0x89   : > { %440 = vmatprep.mubr.f32.mxu0 %v1607_v0 }
  0x8c   : > { %441 = vmatmul.mubr.f32.gmra.mxu0 %v291_v38 }
  0x8d   : > { %446 = vmatprep.mubr.f32.mxu0 %v1607_v0 }
  0x90   : > { %447 = vmatmul.mubr.f32.gmra.mxu0 %v292_v39 }
  0x91   : > { %452 = vmatprep.mubr.f32.mxu0 %v1607_v0 }
  0x94   : > { %453 = vmatmul.mubr.f32.gmra.mxu0 %v293_v40 }
  0x95   : > { %458 = vmatprep.mubr.f32.mxu0 %v1607_v0 }
  0x98   : > { %459 = vmatmul.mubr.f32.gmra.mxu0 %v294_v41 }
  0x99   : > { %464 = vmatprep.mubr.f32.mxu0 %v1607_v0 }
  0x9c   : > { %465 = vmatmul.mubr.f32.gmra.mxu0 %v295_v42 }
  0x9d   : > { %470 = vmatprep.mubr.f32.mxu0 %v1607_v0 }
  0xa0   : > { %471 = vmatmul.mubr.f32.gmra.mxu0 %v296_v43 }
  0xa1   : > { %476 = vmatprep.mubr.f32.mxu0 %v1607_v0 }
  0xa4   : > { %477 = vmatmul.mubr.f32.gmra.mxu0 %v297_v44 }
  0xa5   : > { %482 = vmatprep.mubr.f32.mxu0 %v1607_v0 }
  0xa8   : > { %483 = vmatmul.mubr.f32.gmra.mxu0 %v298_v45 }
  0xa9   : > { %488 = vmatprep.mubr.f32.mxu0 %v1607_v0 }
  0xac   : > { %489 = vmatmul.mubr.f32.gmra.mxu0 %v299_v46 }
  0xad   : > { %494 = vmatprep.mubr.f32.mxu0 %v1607_v0 }
  0xb0   : > { %495 = vmatmul.mubr.f32.gmra.mxu0 %v300_v47 }
  0xb1   : > { %500 = vmatprep.mubr.f32.mxu0 %v1607_v0 }
  0xb4   : > { %501 = vmatmul.mubr.f32.gmra.mxu0 %v301_v48 }
 0x138   : > { %v412_v60 = vpop.f32.mrf.mxu0 }
 0x139   : > { %v413_v61 = vadd.f32 %v412_v60, %v1836_v58 }
 0x13a   : > { %v414_v62 = vpop.f32.mrf.mxu0 }
 0x13b   : > { %v507_v63 = vmax.f32 %v413_v61, 0.0  ;;  %v415_v0 = vadd.f32 %v414_v62, %v1838_v59 }
 0x13c   : > { %v418_v1 = vpop.f32.mrf.mxu0 }
 0x13d   : > { %539 = vst [vmem:[#allocation2] sm:$0xff] %v507_v63  ;;  %v508_v2 = vmax.f32 %v415_v0, 0.0  ;;  %v419_v3 = vadd.f32 %v418_v1, %v1836_v58 }
 0x13e   : > { %v420_v4 = vpop.f32.mrf.mxu0 }
 0x13f   : > { %540 = vst [vmem:[#allocation2 + $0x8] sm:$0xff] %v508_v2  ;;  %v509_v5 = vmax.f32 %v419_v3, 0.0  ;;  %v421_v6 = vadd.f32 %v420_v4, %v1838_v59 }
 0x140   : > { %v424_v7 = vpop.f32.mrf.mxu0 }
 0x141   : > { %541 = vst [vmem:[#allocation2 + $0x10] sm:$0xff] %v509_v5  ;;  %v510_v8 = vmax.f32 %v421_v6, 0.0  ;;  %v425_v9 = vadd.f32 %v424_v7, %v1836_v58 }
 0x142   : > { %v426_v10 = vpop.f32.mrf.mxu0 }
 0x143   : > { %542 = vst [vmem:[#allocation2 + $0x18] sm:$0xff] %v510_v8  ;;  %v511_v11 = vmax.f32 %v425_v9, 0.0  ;;  %v427_v12 = vadd.f32 %v426_v10, %v1838_v59 }
 0x144   : > { %v430_v13 = vpop.f32.mrf.mxu0 }
 0x145   : > { %543 = vst [vmem:[#allocation2 + $0x20] sm:$0xff] %v511_v11  ;;  %v512_v14 = vmax.f32 %v427_v12, 0.0  ;;  %v431_v15 = vadd.f32 %v430_v13, %v1836_v58 }
 0x146   : > { %v432_v16 = vpop.f32.mrf.mxu0 }
 0x147   : > { %544 = vst [vmem:[#allocation2 + $0x28] sm:$0xff] %v512_v14  ;;  %v513_v17 = vmax.f32 %v431_v15, 0.0  ;;  %v433_v18 = vadd.f32 %v432_v16, %v1838_v59 }
 0x148   : > { %v436_v19 = vpop.f32.mrf.mxu0 }
 0x149   : > { %545 = vst [vmem:[#allocation2 + $0x30] sm:$0xff] %v513_v17  ;;  %v514_v20 = vmax.f32 %v433_v18, 0.0  ;;  %v437_v21 = vadd.f32 %v436_v19, %v1836_v58 }
 0x14a   : > { %v438_v22 = vpop.f32.mrf.mxu0 }
 0x14b   : > { %546 = vst [vmem:[#allocation2 + $0x38] sm:$0xff] %v514_v20  ;;  %v515_v23 = vmax.f32 %v437_v21, 0.0  ;;  %v439_v24 = vadd.f32 %v438_v22, %v1838_v59 }
 0x14c   : > { %v442_v25 = vpop.f32.mrf.mxu0 }
 0x14d   : > { %547 = vst [vmem:[#allocation2 + $0x40] sm:$0xff] %v515_v23  ;;  %v516_v26 = vmax.f32 %v439_v24, 0.0  ;;  %v443_v27 = vadd.f32 %v442_v25, %v1836_v58 }
 0x14e   : > { %v444_v28 = vpop.f32.mrf.mxu0 }
 0x14f   : > { %548 = vst [vmem:[#allocation2 + $0x48] sm:$0xff] %v516_v26  ;;  %v517_v29 = vmax.f32 %v443_v27, 0.0  ;;  %v445_v30 = vadd.f32 %v444_v28, %v1838_v59 }
 0x150   : > { %v448_v31 = vpop.f32.mrf.mxu0 }
 0x151   : > { %549 = vst [vmem:[#allocation2 + $0x50] sm:$0xff] %v517_v29  ;;  %v518_v32 = vmax.f32 %v445_v30, 0.0  ;;  %v449_v33 = vadd.f32 %v448_v31, %v1836_v58 }
 0x152   : > { %v450_v34 = vpop.f32.mrf.mxu0 }
 0x153   : > { %550 = vst [vmem:[#allocation2 + $0x58] sm:$0xff] %v518_v32  ;;  %v519_v35 = vmax.f32 %v449_v33, 0.0  ;;  %v451_v36 = vadd.f32 %v450_v34, %v1838_v59 }
 0x154   : > { %v454_v37 = vpop.f32.mrf.mxu0 }
 0x155   : > { %551 = vst [vmem:[#allocation2 + $0x60] sm:$0xff] %v519_v35  ;;  %v520_v38 = vmax.f32 %v451_v36, 0.0  ;;  %v455_v39 = vadd.f32 %v454_v37, %v1836_v58 }
 0x156   : > { %v456_v40 = vpop.f32.mrf.mxu0 }
 0x157   : > { %552 = vst [vmem:[#allocation2 + $0x68] sm:$0xff] %v520_v38  ;;  %v521_v41 = vmax.f32 %v455_v39, 0.0  ;;  %v457_v42 = vadd.f32 %v456_v40, %v1838_v59 }
 0x158   : > { %v460_v43 = vpop.f32.mrf.mxu0 }
 0x159   : > { %553 = vst [vmem:[#allocation2 + $0x70] sm:$0xff] %v521_v41  ;;  %v522_v44 = vmax.f32 %v457_v42, 0.0  ;;  %v461_v45 = vadd.f32 %v460_v43, %v1836_v58 }
 0x15a   : > { %v462_v46 = vpop.f32.mrf.mxu0 }
 0x15b   : > { %554 = vst [vmem:[#allocation2 + $0x78] sm:$0xff] %v522_v44  ;;  %v523_v47 = vmax.f32 %v461_v45, 0.0  ;;  %v463_v48 = vadd.f32 %v462_v46, %v1838_v59 }
 0x15c   : > { %v466_v49 = vpop.f32.mrf.mxu0 }
 0x15d   : > { %555 = vst [vmem:[#allocation2 + $0x80] sm:$0xff] %v523_v47  ;;  %v524_v54 = vmax.f32 %v463_v48, 0.0  ;;  %v467_v55 = vadd.f32 %v466_v49, %v1836_v58 }
 0x15e   : > { %v468_v56 = vpop.f32.mrf.mxu0 }
 0x15f   : > { %556 = vst [vmem:[#allocation2 + $0x88] sm:$0xff] %v524_v54  ;;  %v525_v57 = vmax.f32 %v467_v55, 0.0  ;;  %v469_v60 = vadd.f32 %v468_v56, %v1838_v59 }
 0x160   : > { %v472_v61 = vpop.f32.mrf.mxu0 }
 0x161   : > { %557 = vst [vmem:[#allocation2 + $0x90] sm:$0xff] %v525_v57  ;;  %v526_v62 = vmax.f32 %v469_v60, 0.0  ;;  %v473_v63 = vadd.f32 %v472_v61, %v1836_v58 }
 0x162   : > { %v474_v0 = vpop.f32.mrf.mxu0 }
 0x163   : > { %558 = vst [vmem:[#allocation2 + $0x98] sm:$0xff] %v526_v62  ;;  %v527_v1 = vmax.f32 %v473_v63, 0.0  ;;  %v475_v2 = vadd.f32 %v474_v0, %v1838_v59 }
 0x164   : > { %v478_v3 = vpop.f32.mrf.mxu0 }
 0x165   : > { %559 = vst [vmem:[#allocation2 + $0xa0] sm:$0xff] %v527_v1  ;;  %v528_v4 = vmax.f32 %v475_v2, 0.0  ;;  %v479_v5 = vadd.f32 %v478_v3, %v1836_v58 }
 0x166   : > { %v480_v6 = vpop.f32.mrf.mxu0 }
 0x167   : > { %560 = vst [vmem:[#allocation2 + $0xa8] sm:$0xff] %v528_v4  ;;  %v529_v7 = vmax.f32 %v479_v5, 0.0  ;;  %v481_v8 = vadd.f32 %v480_v6, %v1838_v59 }
 0x168   : > { %v484_v9 = vpop.f32.mrf.mxu0 }
 0x169   : > { %561 = vst [vmem:[#allocation2 + $0xb0] sm:$0xff] %v529_v7  ;;  %v530_v10 = vmax.f32 %v481_v8, 0.0  ;;  %v485_v11 = vadd.f32 %v484_v9, %v1836_v58 }
 0x16a   : > { %v486_v12 = vpop.f32.mrf.mxu0 }
 0x16b   : > { %562 = vst [vmem:[#allocation2 + $0xb8] sm:$0xff] %v530_v10  ;;  %v531_v13 = vmax.f32 %v485_v11, 0.0  ;;  %v487_v14 = vadd.f32 %v486_v12, %v1838_v59 }
 0x16c   : > { %v490_v15 = vpop.f32.mrf.mxu0 }
 0x16d   : > { %563 = vst [vmem:[#allocation2 + $0xc0] sm:$0xff] %v531_v13  ;;  %v532_v16 = vmax.f32 %v487_v14, 0.0  ;;  %v491_v17 = vadd.f32 %v490_v15, %v1836_v58 }
 0x16e   : > { %v492_v18 = vpop.f32.mrf.mxu0 }
 0x16f   : > { %564 = vst [vmem:[#allocation2 + $0xc8] sm:$0xff] %v532_v16  ;;  %v533_v19 = vmax.f32 %v491_v17, 0.0  ;;  %v493_v20 = vadd.f32 %v492_v18, %v1838_v59 }
 0x170   : > { %v496_v21 = vpop.f32.mrf.mxu0 }
 0x171   : > { %565 = vst [vmem:[#allocation2 + $0xd0] sm:$0xff] %v533_v19  ;;  %v534_v22 = vmax.f32 %v493_v20, 0.0  ;;  %v497_v23 = vadd.f32 %v496_v21, %v1836_v58 }
 0x172   : > { %v498_v24 = vpop.f32.mrf.mxu0 }
 0x173   : > { %566 = vst [vmem:[#allocation2 + $0xd8] sm:$0xff] %v534_v22  ;;  %v535_v25 = vmax.f32 %v497_v23, 0.0  ;;  %v499_v26 = vadd.f32 %v498_v24, %v1838_v59 }
 0x174   : > { %v502_v27 = vpop.f32.mrf.mxu0 }
 0x175   : > { %567 = vst [vmem:[#allocation2 + $0xe0] sm:$0xff] %v535_v25  ;;  %v536_v28 = vmax.f32 %v499_v26, 0.0  ;;  %v503_v29 = vadd.f32 %v502_v27, %v1836_v58 }
 0x176   : > { %v504_v30 = vpop.f32.mrf.mxu0 }
 0x177   : > { %568 = vst [vmem:[#allocation2 + $0xe8] sm:$0xff] %v536_v28  ;;  %v537_v31 = vmax.f32 %v503_v29, 0.0  ;;  %v505_v32 = vadd.f32 %v504_v30, %v1838_v59 }
 0x179   : > { %569 = vst [vmem:[#allocation2 + $0xf0] sm:$0xff] %v537_v31  ;;  %v538_v33 = vmax.f32 %v505_v32, 0.0 }
 0x17b   : > { %570 = vst [vmem:[#allocation2 + $0xf8] sm:$0xff] %v538_v33 }
 0x17c LB: >> { %s1226_s8 = sshll.u32 %s1598_s16, 3  ;;  %s581_s16 = sadd.s32 1, %s1598_s16   ;;  %s1598_s16 = sphi %s1880_s16, %s581_s16  }
 0x17d   : >> { %s583_s9 = sshra.s32 %s1226_s8, 3  ;;  %p578_p11 = scmp.ge.s32.totalorder %s581_s16, 16  }
 0x17e   : >> { %s1239_s30 = sshll.u32 %s583_s9, 4  ;;  %s1241_s27 = sshll.u32 (%p578_p11), %s1665_s22, 12 }
 0x17f   : >> { %s1886_s11 = scalar_lea.vmem [#allocation2], %s1239_s30  ;;  %s1065_s23 = sshll.u32 (%p578_p11), %s1874_s10, 4  ;;  %s2080_s23 = int_to_ptr.vmem [resolvable:$true] %s1065_s23 }
 0x180   : > { %s2078_s15 = scalar_lea.hbm (%p578_p11), %s2175_s4, %s1241_s27  ;;  %s1046_s26 = scalar_lea.sflag (%p578_p11), [#allocation5], %s1777_s6 }
 0x181   : > { %s1492_s24 = scalar_lea.vmem (%p578_p11), %s2080_s23, 4096  ;;  %p2194_p1 = scmp.ne.s32.totalorder (%p578_p11), %s2187_s29, 0 }
 0x182   : >> { %v1889_v58 = vld [vmem:[%s1886_s11] sm:$0xff]  ;;  %v1892_v59 = vld [vmem:[%s1886_s11 + $0x8] sm:$0xff]  ;;  %p1493_p10 = scmp.ne.s32.totalorder (%p578_p11), %s2080_s23, %s1492_s24  ;;  %s1608_s14 = smov (%p578_p11), [#allocation9]  }
 0x183   : >> { %v592_v34 = vand.u32 4294967040, %v1889_v58  ;;  %v593_v35 = vand.u32 4294967040, %v1892_v59  ;;  %s1496_s16 = sshll.u32 (%p578_p11), %s1608_s14, 4  ;;  %s1497_s16 = int_to_ptr.vmem [resolvable:$false] %s1496_s16 }
 0x184   : > { %p1494_p2 = pnand (%p578_p11), %p1493_p10, %p2194_p1  ;;  %p1499_p12 = scmp.lt.s32.totalorder (%p578_p11), %s2080_s23, %s1497_s16 }
 0x185   : >> { %v594_v36 = vor.u32 %v592_v34, %v574_v52  ;;  %v595_v37 = vor.u32 %v593_v35, %v575_v53  ;;  %v861_v52 = vld [vmem:[#allocation8 + $0x48] sm:$0xff] (%p578_p11)  ;;  %v876_v53 = vld [vmem:[#allocation8 + $0xc0] sm:$0xff] (%p578_p11) }
 0x186   : > { %p1495_p6 = pneg (%p578_p11), %p1494_p2 }
 0x187   : >> { %vm596_vm0 = vcmp.gt.s32.totalorder %v594_v36, %v595_v37 }
 0x188   : >> { %v597_v38 = vsel %vm596_vm0, %v594_v36, %v595_v37 }
 0x189   : >> { %v599_v39 = vshra.s32 %v597_v38, 16  ;;  %v598_v41 = vand.u32 65535, %v597_v38 }
 0x18b   : >> { %v601_v40 = vcvt.s32.f32 %v599_v39  ;;  %v600_v42 = vcvt.s32.f32 %v598_v41 }
 0x18d   : >> { %602 = vmax.xlane.f32.xlu0 %v601_v40 }
 0x216   : >> { %v603_v43 = vpop.xlane.xlu0 %602 }
 0x217   : >> { %vm604_vm1 = vcmp.eq.f32.partialorder %v601_v40, %v603_v43  ;;  %v609_v45 = vcvt.f32.s32 %v603_v43 }
 0x218   : >> { %v605_v44 = vsel %vm604_vm1, %v600_v42, -inf }
 0x219   : >> { %606 = vmax.xlane.f32.xlu0 %v605_v44  ;;  %v610_v47 = vshll.u32 %v609_v45, 16 }
 0x2a2   : >> { %v607_v46 = vpop.xlane.xlu0 %606 }
 0x2a3   : >> { %v608_v48 = vcvt.f32.s32 %v607_v46 }
 0x2a5   : >> { %v611_v49 = vadd.s32 %v610_v47, %v608_v48 }
 0x2a7   : >> { %v612_v54 = vand.u32 255, %v611_v49 }
 0x2a9   : >> { %v613_v55 = vsub.s32 255, %v612_v54 }
 0x2ab   : >> { %vm614_vm2 = vcmp.eq.s32.totalorder %v1826_v50, %v613_v55  ;;  %vm615_vm3 = vcmp.eq.s32.totalorder %v1829_v51, %v613_v55 }
 0x2ac   : >> { %v618_v56 = vsel %vm614_vm2, 4294967295, %v594_v36  ;;  %v619_v57 = vsel %vm615_vm3, 4294967295, %v595_v37  ;;  %v616_v10 = vsel %vm614_vm2, %v1889_v58, 0.0  ;;  %v617_v11 = vsel %vm615_vm3, %v1892_v59, 0.0 }
 0x2ad   : >> { %vm620_vm4 = vcmp.gt.s32.totalorder %v618_v56, %v619_v57 }
 0x2ae   : >> { %v621_v60 = vsel %vm620_vm4, %v618_v56, %v619_v57 }
 0x2af   : >> { %v623_v61 = vshra.s32 %v621_v60, 16  ;;  %v622_v63 = vand.u32 65535, %v621_v60 }
 0x2b1   : >> { %v625_v62 = vcvt.s32.f32 %v623_v61  ;;  %v624_v1 = vcvt.s32.f32 %v622_v63 }
 0x2b3   : >> { %626 = vmax.xlane.f32.xlu1 %v625_v62 }
 0x33c   : >> { %v627_v0 = vpop.xlane.xlu1 %626 }
 0x33d   : >> { %vm628_vm5 = vcmp.eq.f32.partialorder %v625_v62, %v627_v0  ;;  %v633_v3 = vcvt.f32.s32 %v627_v0 }
 0x33e   : >> { %v629_v2 = vsel %vm628_vm5, %v624_v1, -inf }
 0x33f   : >> { %630 = vmax.xlane.f32.xlu1 %v629_v2  ;;  %v634_v5 = vshll.u32 %v633_v3, 16 }
 0x3c8   : >> { %v631_v4 = vpop.xlane.xlu1 %630 }
 0x3c9   : >> { %v632_v6 = vcvt.f32.s32 %v631_v4 }
 0x3cb   : >> { %v635_v7 = vadd.s32 %v634_v5, %v632_v6 }
 0x3cd   : >> { %v636_v8 = vand.u32 255, %v635_v7 }
 0x3cf   : >> { %v637_v9 = vsub.s32 255, %v636_v8 }
 0x3d1   : >> { %vm638_vm6 = vcmp.eq.s32.totalorder %v1826_v50, %v637_v9  ;;  %vm639_vm7 = vcmp.eq.s32.totalorder %v1829_v51, %v637_v9 }
 0x3d2   : >> { %v640_v12 = vsel %vm638_vm6, %v1889_v58, %v616_v10  ;;  %v641_v13 = vsel %vm639_vm7, %v1892_v59, %v617_v11  ;;  %v642_v14 = vsel %vm638_vm6, 4294967295, %v618_v56  ;;  %v643_v15 = vsel %vm639_vm7, 4294967295, %v619_v57 }
 0x3d3   : >> { %vm644_vm8 = vcmp.gt.s32.totalorder %v642_v14, %v643_v15 }
 0x3d4   : >> { %v645_v16 = vsel %vm644_vm8, %v642_v14, %v643_v15 }
 0x3d5   : >> { %v647_v17 = vshra.s32 %v645_v16, 16  ;;  %v646_v19 = vand.u32 65535, %v645_v16 }
 0x3d7   : >> { %v649_v18 = vcvt.s32.f32 %v647_v17  ;;  %v648_v21 = vcvt.s32.f32 %v646_v19 }
 0x3d9   : >> { %650 = vmax.xlane.f32.xlu0 %v649_v18 }
 0x462   : >> { %v651_v20 = vpop.xlane.xlu0 %650 }
 0x463   : >> { %vm652_vm9 = vcmp.eq.f32.partialorder %v649_v18, %v651_v20  ;;  %v657_v23 = vcvt.f32.s32 %v651_v20 }
 0x464   : >> { %v653_v22 = vsel %vm652_vm9, %v648_v21, -inf }
 0x465   : >> { %654 = vmax.xlane.f32.xlu1 %v653_v22  ;;  %v658_v25 = vshll.u32 %v657_v23, 16 }
 0x4ee   : >> { %v655_v24 = vpop.xlane.xlu1 %654 }
 0x4ef   : >> { %v656_v26 = vcvt.f32.s32 %v655_v24 }
 0x4f1   : >> { %v659_v27 = vadd.s32 %v658_v25, %v656_v26 }
 0x4f3   : >> { %v660_v28 = vand.u32 255, %v659_v27 }
 0x4f5   : >> { %v661_v29 = vsub.s32 255, %v660_v28 }
 0x4f7   : >> { %vm662_vm10 = vcmp.eq.s32.totalorder %v1826_v50, %v661_v29  ;;  %vm663_vm11 = vcmp.eq.s32.totalorder %v1829_v51, %v661_v29 }
 0x4f8   : >> { %v664_v30 = vsel %vm662_vm10, %v1889_v58, %v640_v12  ;;  %v665_v31 = vsel %vm663_vm11, %v1892_v59, %v641_v13  ;;  %v666_v32 = vsel %vm662_vm10, 4294967295, %v642_v14  ;;  %v667_v33 = vsel %vm663_vm11, 4294967295, %v643_v15 }
 0x4f9   : >> { %vm668_vm12 = vcmp.gt.s32.totalorder %v666_v32, %v667_v33 }
 0x4fa   : >> { %v669_v34 = vsel %vm668_vm12, %v666_v32, %v667_v33 }
 0x4fb   : >> { %v671_v35 = vshra.s32 %v669_v34, 16  ;;  %v670_v37 = vand.u32 65535, %v669_v34 }
 0x4fd   : >> { %v673_v36 = vcvt.s32.f32 %v671_v35  ;;  %v672_v39 = vcvt.s32.f32 %v670_v37 }
 0x4ff   : >> { %674 = vmax.xlane.f32.xlu0 %v673_v36 }
 0x588   : >> { %v675_v38 = vpop.xlane.xlu0 %674 }
 0x589   : >> { %vm676_vm13 = vcmp.eq.f32.partialorder %v673_v36, %v675_v38  ;;  %v681_v41 = vcvt.f32.s32 %v675_v38 }
 0x58a   : >> { %v677_v40 = vsel %vm676_vm13, %v672_v39, -inf }
 0x58b   : >> { %678 = vmax.xlane.f32.xlu1 %v677_v40  ;;  %v682_v43 = vshll.u32 %v681_v41, 16 }
 0x614   : >> { %v679_v42 = vpop.xlane.xlu1 %678 }
 0x615   : >> { %v680_v44 = vcvt.f32.s32 %v679_v42 }
 0x617   : >> { %v683_v45 = vadd.s32 %v682_v43, %v680_v44 }
 0x619   : >> { %v684_v46 = vand.u32 255, %v683_v45 }
 0x61b   : >> { %v685_v47 = vsub.s32 255, %v684_v46 }
 0x61d   : >> { %vm686_vm14 = vcmp.eq.s32.totalorder %v1826_v50, %v685_v47  ;;  %vm687_vm15 = vcmp.eq.s32.totalorder %v1829_v51, %v685_v47 }
 0x61e   : >> { %v688_v48 = vsel %vm686_vm14, %v1889_v58, %v664_v30  ;;  %v689_v49 = vsel %vm687_vm15, %v1892_v59, %v665_v31  ;;  %v690_v54 = vsel %vm686_vm14, 4294967295, %v666_v32  ;;  %v691_v55 = vsel %vm687_vm15, 4294967295, %v667_v33 }
 0x61f   : >> { %vm692_vm0 = vcmp.gt.s32.totalorder %v690_v54, %v691_v55 }
 0x620   : >> { %v693_v56 = vsel %vm692_vm0, %v690_v54, %v691_v55 }
 0x621   : >> { %v695_v57 = vshra.s32 %v693_v56, 16  ;;  %v694_v61 = vand.u32 65535, %v693_v56 }
 0x623   : >> { %v697_v60 = vcvt.s32.f32 %v695_v57  ;;  %v696_v63 = vcvt.s32.f32 %v694_v61 }
 0x625   : >> { %698 = vmax.xlane.f32.xlu0 %v697_v60 }
 0x6ae   : >> { %v699_v62 = vpop.xlane.xlu0 %698 }
 0x6af   : >> { %vm700_vm1 = vcmp.eq.f32.partialorder %v697_v60, %v699_v62  ;;  %v705_v1 = vcvt.f32.s32 %v699_v62 }
 0x6b0   : >> { %v701_v0 = vsel %vm700_vm1, %v696_v63, -inf }
 0x6b1   : >> { %702 = vmax.xlane.f32.xlu1 %v701_v0  ;;  %v706_v3 = vshll.u32 %v705_v1, 16 }
 0x73a   : >> { %v703_v2 = vpop.xlane.xlu1 %702 }
 0x73b   : >> { %v704_v4 = vcvt.f32.s32 %v703_v2 }
 0x73d   : >> { %v707_v5 = vadd.s32 %v706_v3, %v704_v4 }
 0x73f   : >> { %v708_v6 = vand.u32 255, %v707_v5 }
 0x741   : >> { %v709_v7 = vsub.s32 255, %v708_v6  ;;  %v883_v6 = vld [vmem:[#allocation8 + $0xf8] sm:$0xff] (%p578_p11) }
 0x742   : > { %1243 = vmatprep.subr.mxu1 (%p578_p11), %v883_v6 }
 0x743   : >> { %vm710_vm2 = vcmp.eq.s32.totalorder %v1826_v50, %v709_v7  ;;  %vm711_vm3 = vcmp.eq.s32.totalorder %v1829_v51, %v709_v7  ;;  %v867_v7 = vld [vmem:[#allocation8 + $0x78] sm:$0xff] (%p578_p11) }
 0x744   : >> { %v712_v8 = vsel %vm710_vm2, %v1889_v58, %v688_v48  ;;  %v713_v9 = vsel %vm711_vm3, %v1892_v59, %v689_v49  ;;  %v714_v10 = vsel %vm710_vm2, 4294967295, %v690_v54  ;;  %v715_v11 = vsel %vm711_vm3, 4294967295, %v691_v55  ;;  %1244 = vmatpush3.msra.mxu1 (%p578_p11), %v867_v7 }
 0x745   : >> { %vm716_vm4 = vcmp.gt.s32.totalorder %v714_v10, %v715_v11 }
 0x746   : >> { %v717_v12 = vsel %vm716_vm4, %v714_v10, %v715_v11 }
 0x747   : >> { %v719_v13 = vshra.s32 %v717_v12, 16  ;;  %v718_v15 = vand.u32 65535, %v717_v12  ;;  %v879_v12 = vld [vmem:[#allocation8 + $0xd8] sm:$0xff] (%p578_p11) }
 0x749   : >> { %v721_v14 = vcvt.s32.f32 %v719_v13  ;;  %v720_v17 = vcvt.s32.f32 %v718_v15  ;;  %v863_v13 = vld [vmem:[#allocation8 + $0x58] sm:$0xff] (%p578_p11) }
 0x74b   : >> { %722 = vmax.xlane.f32.xlu0 %v721_v14 }
 0x7d4   : >> { %v723_v16 = vpop.xlane.xlu0 %722 }
 0x7d5   : >> { %vm724_vm5 = vcmp.eq.f32.partialorder %v721_v14, %v723_v16  ;;  %v729_v19 = vcvt.f32.s32 %v723_v16  ;;  %v878_v14 = vld [vmem:[#allocation8 + $0xd0] sm:$0xff] (%p578_p11)  ;;  %v860_v16 = vld [vmem:[#allocation8 + $0x40] sm:$0xff] (%p578_p11) }
 0x7d6   : >> { %v725_v18 = vsel %vm724_vm5, %v720_v17, -inf }
 0x7d7   : >> { %726 = vmax.xlane.f32.xlu1 %v725_v18  ;;  %v730_v21 = vshll.u32 %v729_v19, 16 }
 0x860   : >> { %v727_v20 = vpop.xlane.xlu1 %726 }
 0x861   : >> { %v728_v22 = vcvt.f32.s32 %v727_v20  ;;  %v875_v20 = vld [vmem:[#allocation8 + $0xb8] sm:$0xff] (%p578_p11) }
 0x863   : >> { %v731_v23 = vadd.s32 %v730_v21, %v728_v22 }
 0x865   : >> { %v732_v24 = vand.u32 255, %v731_v23 }
 0x867   : >> { %v733_v25 = vsub.s32 255, %v732_v24  ;;  %v859_v24 = vld [vmem:[#allocation8 + $0x38] sm:$0xff] (%p578_p11) }
 0x869   : >> { %vm734_vm6 = vcmp.eq.s32.totalorder %v1826_v50, %v733_v25  ;;  %vm735_vm7 = vcmp.eq.s32.totalorder %v1829_v51, %v733_v25 }
 0x86a   : >> { %v736_v26 = vsel %vm734_vm6, %v1889_v58, %v712_v8  ;;  %v737_v27 = vsel %vm735_vm7, %v1892_v59, %v713_v9  ;;  %v738_v28 = vsel %vm734_vm6, 4294967295, %v714_v10  ;;  %v739_v29 = vsel %vm735_vm7, 4294967295, %v715_v11  ;;  %v882_v8 = vld [vmem:[#allocation8 + $0xf0] sm:$0xff] (%p578_p11)  ;;  %v881_v10 = vld [vmem:[#allocation8 + $0xe8] sm:$0xff] (%p578_p11) }
 0x86b   : >> { %vm740_vm8 = vcmp.gt.s32.totalorder %v738_v28, %v739_v29  ;;  %v866_v9 = vld [vmem:[#allocation8 + $0x70] sm:$0xff] (%p578_p11)  ;;  %1245 = vmatprep.subr.mxu1 (%p578_p11), %v882_v8  ;;  %v865_v11 = vld [vmem:[#allocation8 + $0x68] sm:$0xff] (%p578_p11) }
 0x86c   : >> { %v741_v30 = vsel %vm740_vm8, %v738_v28, %v739_v29  ;;  %1246 = vmatpush3.msra.mxu1 (%p578_p11), %v866_v9 }
 0x86d   : >> { %v743_v31 = vshra.s32 %v741_v30, 16  ;;  %v742_v33 = vand.u32 65535, %v741_v30  ;;  %1247 = vmatprep.subr.mxu1 (%p578_p11), %v881_v10 }
 0x86e   : > { %1248 = vmatpush3.msra.mxu1 (%p578_p11), %v865_v11 }
 0x86f   : >> { %v745_v32 = vcvt.s32.f32 %v743_v31  ;;  %v744_v35 = vcvt.s32.f32 %v742_v33 }
 0x871   : >> { %746 = vmax.xlane.f32.xlu0 %v745_v32 }
 0x8fa   : >> { %v747_v34 = vpop.xlane.xlu0 %746 }
 0x8fb   : >> { %vm748_vm9 = vcmp.eq.f32.partialorder %v745_v32, %v747_v34  ;;  %v753_v37 = vcvt.f32.s32 %v747_v34  ;;  %v858_v32 = vld [vmem:[#allocation8 + $0x30] sm:$0xff] (%p578_p11) }
 0x8fc   : >> { %v749_v36 = vsel %vm748_vm9, %v744_v35, -inf }
 0x8fd   : >> { %750 = vmax.xlane.f32.xlu1 %v749_v36  ;;  %v754_v39 = vshll.u32 %v753_v37, 16  ;;  %v873_v36 = vld [vmem:[#allocation8 + $0xa8] sm:$0xff] (%p578_p11) }
 0x986   : >> { %v751_v38 = vpop.xlane.xlu1 %750 }
 0x987   : >> { %v752_v40 = vcvt.f32.s32 %v751_v38 }
 0x989   : >> { %v755_v41 = vadd.s32 %v754_v39, %v752_v40  ;;  %v857_v40 = vld [vmem:[#allocation8 + $0x28] sm:$0xff] (%p578_p11) }
 0x98b   : >> { %v756_v42 = vand.u32 255, %v755_v41 }
 0x98d   : >> { %v757_v43 = vsub.s32 255, %v756_v42 }
 0x98f   : >> { %vm758_vm10 = vcmp.eq.s32.totalorder %v1826_v50, %v757_v43  ;;  %vm759_vm11 = vcmp.eq.s32.totalorder %v1829_v51, %v757_v43 }
 0x990   : >> { %v760_v44 = vsel %vm758_vm10, %v1889_v58, %v736_v26  ;;  %v761_v45 = vsel %vm759_vm11, %v1892_v59, %v737_v27  ;;  %v762_v46 = vsel %vm758_vm10, 4294967295, %v738_v28  ;;  %v763_v47 = vsel %vm759_vm11, 4294967295, %v739_v29  ;;  %v874_v28 = vld [vmem:[#allocation8 + $0xb0] sm:$0xff] (%p578_p11) }
 0x991   : >> { %vm764_vm12 = vcmp.gt.s32.totalorder %v762_v46, %v763_v47 }
 0x992   : >> { %v765_v48 = vsel %vm764_vm12, %v762_v46, %v763_v47 }
 0x993   : >> { %v767_v49 = vshra.s32 %v765_v48, 16  ;;  %v766_v55 = vand.u32 65535, %v765_v48 }
 0x995   : >> { %v769_v54 = vcvt.s32.f32 %v767_v49  ;;  %v768_v57 = vcvt.s32.f32 %v766_v55 }
 0x997   : >> { %770 = vmax.xlane.f32.xlu0 %v769_v54 }
 0xa20   : >> { %v771_v56 = vpop.xlane.xlu0 %770 }
 0xa21   : >> { %vm772_vm13 = vcmp.eq.f32.partialorder %v769_v54, %v771_v56  ;;  %v777_v61 = vcvt.f32.s32 %v771_v56 }
 0xa22   : >> { %v773_v60 = vsel %vm772_vm13, %v768_v57, -inf }
 0xa23   : >> { %774 = vmax.xlane.f32.xlu1 %v773_v60  ;;  %v778_v63 = vshll.u32 %v777_v61, 16  ;;  %v856_v60 = vld [vmem:[#allocation8 + $0x20] sm:$0xff] (%p578_p11) }
 0xaac   : >> { %v775_v62 = vpop.xlane.xlu1 %774 }
 0xaad   : >> { %v776_v0 = vcvt.f32.s32 %v775_v62  ;;  %v871_v62 = vld [vmem:[#allocation8 + $0x98] sm:$0xff] (%p578_p11) }
 0xaaf   : >> { %v779_v1 = vadd.s32 %v778_v63, %v776_v0  ;;  %v855_v63 = vld [vmem:[#allocation8 + $0x18] sm:$0xff] (%p578_p11)  ;;  %v870_v0 = vld [vmem:[#allocation8 + $0x90] sm:$0xff] (%p578_p11) }
 0xab1   : >> { %v780_v2 = vand.u32 255, %v779_v1  ;;  %v854_v1 = vld [vmem:[#allocation8 + $0x10] sm:$0xff] (%p578_p11) }
 0xab3   : >> { %v781_v3 = vsub.s32 255, %v780_v2  ;;  %580 = sbr.rel (!%p578_p11) target bundleno = 380 (0x17c), region = 114  ;;  %v869_v2 = vld [vmem:[#allocation8 + $0x88] sm:$0xff] (%p578_p11) }
 0xab5   : >> { %vm782_vm14 = vcmp.eq.s32.totalorder %v1826_v50, %v781_v3  ;;  %vm783_vm15 = vcmp.eq.s32.totalorder %v1829_v51, %v781_v3  ;;  %v862_v50 = vld [vmem:[#allocation8 + $0x50] sm:$0xff] (%p578_p11)  ;;  %v877_v51 = vld [vmem:[#allocation8 + $0xc8] sm:$0xff] (%p578_p11) }
 0xab6   : >> { %v784_v4 = vsel %vm782_vm14, %v1889_v58, %v760_v44  ;;  %v785_v5 = vsel %vm783_vm15, %v1892_v59, %v761_v45  ;;  %v880_v58 = vld [vmem:[#allocation8 + $0xe0] sm:$0xff] (%p578_p11)  ;;  %v853_v3 = vld [vmem:[#allocation8 + $0x8] sm:$0xff] (%p578_p11) }
 0xab7   : >> { %786 = vst [vmem:[%s1886_s11] sm:$0xff] %v784_v4  ;;  %787 = vst [vmem:[%s1886_s11 + $0x8] sm:$0xff] %v785_v5  ;;  %v864_v59 = vld [vmem:[#allocation8 + $0x60] sm:$0xff] (%p578_p11)  ;;  %1249 = vmatprep.subr.mxu1 (%p578_p11), %v880_v58 }
 0xab8   : > { %1250 = vmatpush3.msra.mxu1 %v864_v59  ;;  %v872_v44 = vld [vmem:[#allocation8 + $0xa0] sm:$0xff] }
 0xab9   : > { %1251 = vmatprep.subr.mxu1 %v879_v12  ;;  %v868_v4 = vld [vmem:[#allocation8 + $0x80] sm:$0xff] }
 0xaba   : > { %1252 = vmatpush3.msra.mxu1 %v863_v13  ;;  %v852_v5 = vld [vmem:[#allocation8] sm:$0xff] }
 0xabb   : > { %1253 = vmatprep.subr.mxu1 %v878_v14 }
 0xabc   : > { %1254 = vmatpush3.msra.mxu1 %v862_v50 }
 0xabd   : > { %1255 = vmatprep.subr.mxu1 %v877_v51 }
 0xabe   : > { %v789_v15 = vld [vmem:[#allocation2 + $0x8] sm:$0xff]  ;;  %v1946_v17 = vld [vmem:[#allocation2] sm:$0xff]  ;;  %v1948_v18 = vld [vmem:[#allocation2 + $0x18] sm:$0xff]  ;;  %1256 = vmatpush3.msra.mxu1 %v861_v52 }
 0xabf   : > { %821 = vst [vmem:[%s1874_s10 + $0x8] sm:$0xff] %v789_v15  ;;  %948 = vmatprep.mubr.f32.mxu1 %v789_v15  ;;  %v1950_v19 = vld [vmem:[#allocation2 + $0x10] sm:$0xff]  ;;  %820 = vst [vmem:[%s1874_s10] sm:$0xff] %v1946_v17  ;;  %v1958_v21 = vld [vmem:[#allocation2 + $0x28] sm:$0xff]  ;;  %1257 = vmatprep.subr.mxu1 %v876_v53 }
 0xac0   : > { %823 = vst [vmem:[%s1874_s10 + $0x18] sm:$0xff] %v1948_v18  ;;  %822 = vst [vmem:[%s1874_s10 + $0x10] sm:$0xff] %v1950_v19  ;;  %v1960_v22 = vld [vmem:[#allocation2 + $0x20] sm:$0xff]  ;;  %v1962_v23 = vld [vmem:[#allocation2 + $0x38] sm:$0xff]  ;;  %1258 = vmatpush3.msra.mxu1 %v860_v16 }
 0xac1   : > { %825 = vst [vmem:[%s1874_s10 + $0x28] sm:$0xff] %v1958_v21  ;;  %824 = vst [vmem:[%s1874_s10 + $0x20] sm:$0xff] %v1960_v22  ;;  %v1970_v25 = vld [vmem:[#allocation2 + $0x30] sm:$0xff]  ;;  %v1972_v26 = vld [vmem:[#allocation2 + $0x48] sm:$0xff]  ;;  %1259 = vmatprep.subr.mxu1 %v875_v20 }
 0xac2   : > { %827 = vst [vmem:[%s1874_s10 + $0x38] sm:$0xff] %v1962_v23  ;;  %v1974_v27 = vld [vmem:[#allocation2 + $0x40] sm:$0xff]  ;;  %826 = vst [vmem:[%s1874_s10 + $0x30] sm:$0xff] %v1970_v25  ;;  %v1982_v29 = vld [vmem:[#allocation2 + $0x58] sm:$0xff]  ;;  %1260 = vmatpush3.msra.mxu1 %v859_v24 }
 0xac3   : > { %829 = vst [vmem:[%s1874_s10 + $0x48] sm:$0xff] %v1972_v26  ;;  %828 = vst [vmem:[%s1874_s10 + $0x40] sm:$0xff] %v1974_v27  ;;  %v1984_v30 = vld [vmem:[#allocation2 + $0x50] sm:$0xff]  ;;  %v1986_v31 = vld [vmem:[#allocation2 + $0x68] sm:$0xff]  ;;  %1261 = vmatprep.subr.mxu1 %v874_v28 }
 0xac4   : > { %831 = vst [vmem:[%s1874_s10 + $0x58] sm:$0xff] %v1982_v29  ;;  %830 = vst [vmem:[%s1874_s10 + $0x50] sm:$0xff] %v1984_v30  ;;  %v1994_v33 = vld [vmem:[#allocation2 + $0x60] sm:$0xff]  ;;  %v1996_v34 = vld [vmem:[#allocation2 + $0x78] sm:$0xff]  ;;  %1262 = vmatpush3.msra.mxu1 %v858_v32 }
 0xac5   : > { %833 = vst [vmem:[%s1874_s10 + $0x68] sm:$0xff] %v1986_v31  ;;  %v1998_v35 = vld [vmem:[#allocation2 + $0x70] sm:$0xff]  ;;  %832 = vst [vmem:[%s1874_s10 + $0x60] sm:$0xff] %v1994_v33  ;;  %v2006_v37 = vld [vmem:[#allocation2 + $0x88] sm:$0xff]  ;;  %1263 = vmatprep.subr.mxu1 %v873_v36 }
 0xac6   : > { %835 = vst [vmem:[%s1874_s10 + $0x78] sm:$0xff] %v1996_v34  ;;  %834 = vst [vmem:[%s1874_s10 + $0x70] sm:$0xff] %v1998_v35  ;;  %v2008_v38 = vld [vmem:[#allocation2 + $0x80] sm:$0xff]  ;;  %v2010_v39 = vld [vmem:[#allocation2 + $0x98] sm:$0xff]  ;;  %1264 = vmatpush3.msra.mxu1 %v857_v40 }
 0xac7   : > { %837 = vst [vmem:[%s1874_s10 + $0x88] sm:$0xff] %v2006_v37  ;;  %836 = vst [vmem:[%s1874_s10 + $0x80] sm:$0xff] %v2008_v38  ;;  %v2018_v41 = vld [vmem:[#allocation2 + $0x90] sm:$0xff]  ;;  %v2020_v42 = vld [vmem:[#allocation2 + $0xa8] sm:$0xff]  ;;  %1265 = vmatprep.subr.mxu1 %v872_v44 }
 0xac8   : > { %839 = vst [vmem:[%s1874_s10 + $0x98] sm:$0xff] %v2010_v39  ;;  %v2022_v43 = vld [vmem:[#allocation2 + $0xa0] sm:$0xff]  ;;  %838 = vst [vmem:[%s1874_s10 + $0x90] sm:$0xff] %v2018_v41  ;;  %v2030_v45 = vld [vmem:[#allocation2 + $0xb8] sm:$0xff]  ;;  %1266 = vmatpush3.msra.mxu1 %v856_v60 }
 0xac9   : > { %841 = vst [vmem:[%s1874_s10 + $0xa8] sm:$0xff] %v2020_v42  ;;  %840 = vst [vmem:[%s1874_s10 + $0xa0] sm:$0xff] %v2022_v43  ;;  %v2032_v46 = vld [vmem:[#allocation2 + $0xb0] sm:$0xff]  ;;  %v2034_v47 = vld [vmem:[#allocation2 + $0xc8] sm:$0xff]  ;;  %1267 = vmatprep.subr.mxu1 %v871_v62 }
 0xaca   : > { %843 = vst [vmem:[%s1874_s10 + $0xb8] sm:$0xff] %v2030_v45  ;;  %842 = vst [vmem:[%s1874_s10 + $0xb0] sm:$0xff] %v2032_v46  ;;  %v812_v48 = vld [vmem:[#allocation2 + $0xc0] sm:$0xff]  ;;  %v815_v49 = vld [vmem:[#allocation2 + $0xd8] sm:$0xff]  ;;  %1268 = vmatpush3.msra.mxu1 %v855_v63 }
 0xacb   : > { %845 = vst [vmem:[%s1874_s10 + $0xc8] sm:$0xff] %v2034_v47  ;;  %v814_v54 = vld [vmem:[#allocation2 + $0xd0] sm:$0xff]  ;;  %844 = vst [vmem:[%s1874_s10 + $0xc0] sm:$0xff] %v812_v48  ;;  %v817_v55 = vld [vmem:[#allocation2 + $0xe8] sm:$0xff]  ;;  %1269 = vmatprep.subr.mxu1 %v870_v0 }
 0xacc   : > { %847 = vst [vmem:[%s1874_s10 + $0xd8] sm:$0xff] %v815_v49  ;;  %846 = vst [vmem:[%s1874_s10 + $0xd0] sm:$0xff] %v814_v54  ;;  %v816_v56 = vld [vmem:[#allocation2 + $0xe0] sm:$0xff]  ;;  %v819_v57 = vld [vmem:[#allocation2 + $0xf8] sm:$0xff]  ;;  %1270 = vmatpush3.msra.mxu1 %v854_v1 }
 0xacd   : > { %849 = vst [vmem:[%s1874_s10 + $0xe8] sm:$0xff] %v817_v55  ;;  %848 = vst [vmem:[%s1874_s10 + $0xe0] sm:$0xff] %v816_v56  ;;  %v818_v61 = vld [vmem:[#allocation2 + $0xf0] sm:$0xff]  ;;  %1271 = vmatprep.subr.mxu1 %v869_v2 }
 0xace   : > { %851 = vst [vmem:[%s1874_s10 + $0xf8] sm:$0xff] %v819_v57  ;;  %850 = vst [vmem:[%s1874_s10 + $0xf0] sm:$0xff] %v818_v61  ;;  %1272 = vmatpush3.msra.mxu1 %v853_v3  ;;  %s1498_s10 = scalar_lea.vmem %s1497_s16, 8192 }
 0xacf   : > { %1273 = vmatprep.subr.mxu1 %v868_v4  ;;  %p1500_p3 = scmp.lt.s32.totalorder %s1498_s10, %s1492_s24 }
 0xad0   : > { %1274 = vmatpush3.msra.mxu1 %v852_v5 }
 0xad1   : > { %949 = vmatmul.mubr.f32.vlgmr.msra.gmra.mxu1 %v1946_v17  ;;  %p1501_p9 = por %p1500_p3, %p1499_p12 }
 0xad2   : > { %953 = vmatprep.mubr.f32.mxu1 %v1948_v18 }
 0xad3   : > { %p1502_p13 = pnand %p1501_p9, %p1495_p6 }
 0xad5   : > { %954 = vmatmul.mubr.f32.gmra.mxu1 %v1950_v19 }
 0xad6   : > { %958 = vmatprep.mubr.f32.mxu1 %v1958_v21 }
 0xad9   : > { %959 = vmatmul.mubr.f32.gmra.mxu1 %v1960_v22 }
 0xada   : > { %963 = vmatprep.mubr.f32.mxu1 %v1962_v23 }
 0xadd   : > { %964 = vmatmul.mubr.f32.gmra.mxu1 %v1970_v25 }
 0xade   : > { %968 = vmatprep.mubr.f32.mxu1 %v1972_v26 }
 0xae1   : > { %969 = vmatmul.mubr.f32.gmra.mxu1 %v1974_v27 }
 0xae2   : > { %973 = vmatprep.mubr.f32.mxu1 %v1982_v29 }
 0xae5   : > { %974 = vmatmul.mubr.f32.gmra.mxu1 %v1984_v30 }
 0xae6   : > { %978 = vmatprep.mubr.f32.mxu1 %v1986_v31 }
 0xae9   : > { %979 = vmatmul.mubr.f32.gmra.mxu1 %v1994_v33 }
 0xaea   : > { %983 = vmatprep.mubr.f32.mxu1 %v1996_v34 }
 0xaed   : > { %984 = vmatmul.mubr.f32.gmra.mxu1 %v1998_v35 }
 0xaee   : > { %988 = vmatprep.mubr.f32.mxu1 %v2006_v37 }
 0xaf1   : > { %989 = vmatmul.mubr.f32.gmra.mxu1 %v2008_v38 }
 0xaf2   : > { %993 = vmatprep.mubr.f32.mxu1 %v2010_v39 }
 0xaf5   : > { %994 = vmatmul.mubr.f32.gmra.mxu1 %v2018_v41 }
 0xaf6   : > { %998 = vmatprep.mubr.f32.mxu1 %v2020_v42 }
 0xaf9   : > { %999 = vmatmul.mubr.f32.gmra.mxu1 %v2022_v43 }
 0xafa   : > { %1003 = vmatprep.mubr.f32.mxu1 %v2030_v45 }
 0xafd   : > { %1004 = vmatmul.mubr.f32.gmra.mxu1 %v2032_v46 }
 0xafe   : > { %1008 = vmatprep.mubr.f32.mxu1 %v2034_v47 }
 0xb01   : > { %1009 = vmatmul.mubr.f32.gmra.mxu1 %v812_v48 }
 0xb02   : > { %1013 = vmatprep.mubr.f32.mxu1 %v815_v49 }
 0xb05   : > { %1014 = vmatmul.mubr.f32.gmra.mxu1 %v814_v54 }
 0xb06   : > { %1018 = vmatprep.mubr.f32.mxu1 %v817_v55 }
 0xb09   : > { %1019 = vmatmul.mubr.f32.gmra.mxu1 %v816_v56 }
 0xb0a   : > { %1023 = vmatprep.mubr.f32.mxu1 %v819_v57 }
 0xb0d   : > { %1024 = vmatmul.mubr.f32.gmra.mxu1 %v818_v61 }
 0xb0e   : > { %1505 = shalt.err (!%p1502_p13)
}
 0xb0f   : > { %s1506_s8 = scalar_lea.hbm %s2078_s15, 4096  ;;  %s1510_s11 = scalar_lea.hbm %s2175_s4, 8192 }
 0xb10   : > { %p1507_p5 = scmp.ne.s32.totalorder %s2078_s15, %s1506_s8  ;;  %p1511_p8 = scmp.lt.s32.totalorder %s2078_s15, %s2175_s4 }
 0xb11   : > { %p1512_p7 = scmp.lt.s32.totalorder %s1510_s11, %s1506_s8 }
 0xb12   : > { %p1508_p0 = pnand %p1507_p5, %p2194_p1 }
 0xb13   : > { %p1513_p11 = por %p1512_p7, %p1511_p8 }
 0xb14   : > { %p1509_p4 = pneg %p1508_p0 }
 0xb16   : > { %p1514_p10 = pnand %p1513_p11, %p1509_p4 }
 0xb18   : > { %1517 = shalt.err (!%p1514_p10)
}
 0xb19   : > { %s1609_s7 = smov 256   ;;  %s1610_s24 = smov 16  }
 0xb1a   : > { %1333 = dma.vmem_to_hbm [thread:$0]  (%p2194_p1), %s2080_s23, 4096, %s2078_s15, %s1046_s26, %s1609_s7, %s1609_s7, %s1610_s24  }
 0xb1b   : > { %s1242_s23 = sshll.u32 %s1665_s22, 11  ;;  %s1081_s15 = sshll.u32 %s1878_s12, 4  ;;  %s2127_s15 = int_to_ptr.vmem [resolvable:$true] %s1081_s15 }
 0xb1c   : > { %s2125_s16 = scalar_lea.hbm %s2176_s5, %s1242_s23  ;;  %s1051_s10 = scalar_lea.sflag [#allocation11], %s1777_s6 }
 0xb1d   : > { %s1518_s8 = scalar_lea.vmem %s2127_s15, 2048  ;;  %s1611_s22 = smov [#allocation10]  }
 0xb1e   : > { %p1519_p2 = scmp.ne.s32.totalorder %s2127_s15, %s1518_s8  ;;  %s1522_s9 = sshll.u32 %s1611_s22, 4  ;;  %s1523_s9 = int_to_ptr.vmem [resolvable:$false] %s1522_s9 }
 0xb1f   : > { %s1524_s30 = scalar_lea.vmem %s1523_s9, 4096  ;;  %p1525_p3 = scmp.lt.s32.totalorder %s2127_s15, %s1523_s9 }
 0xb20   : > { %p1520_p6 = pnand %p1519_p2, %p2194_p1  ;;  %p1526_p9 = scmp.lt.s32.totalorder %s1524_s30, %s1518_s8 }
 0xb22   : > { %p1521_p12 = pneg %p1520_p6  ;;  %p1527_p13 = por %p1526_p9, %p1525_p3 }
 0xb24   : > { %p1528_p5 = pnand %p1527_p13, %p1521_p12 }
 0xb91   : > { %v1275_v6 = vpop.f32.mrf.mxu1 }
 0xb93   : > { %v1276_v7 = vpop.f32.mrf.mxu1 }
 0xb94   : > { %v1277_v8 = vadd.f32 %v1276_v7, %v1275_v6 }
 0xb95   : > { %v1278_v9 = vpop.f32.mrf.mxu1 }
 0xb96   : > { %1029 = vst [vmem:[%s1878_s12] sm:$0xff] %v1277_v8 }
 0xb97   : > { %v1279_v10 = vpop.f32.mrf.mxu1 }
 0xb98   : > { %v1280_v11 = vadd.f32 %v1279_v10, %v1278_v9 }
 0xb99   : > { %v1281_v58 = vpop.f32.mrf.mxu1 }
 0xb9a   : > { %1030 = vst [vmem:[%s1878_s12 + $0x8] sm:$0xff] %v1280_v11 }
 0xb9b   : > { %v1282_v59 = vpop.f32.mrf.mxu1 }
 0xb9c   : > { %v1283_v12 = vadd.f32 %v1282_v59, %v1281_v58 }
 0xb9d   : > { %v1284_v13 = vpop.f32.mrf.mxu1 }
 0xb9e   : > { %1031 = vst [vmem:[%s1878_s12 + $0x10] sm:$0xff] %v1283_v12 }
 0xb9f   : > { %v1285_v14 = vpop.f32.mrf.mxu1 }
 0xba0   : > { %v1286_v50 = vadd.f32 %v1285_v14, %v1284_v13 }
 0xba1   : > { %v1287_v51 = vpop.f32.mrf.mxu1 }
 0xba2   : > { %1032 = vst [vmem:[%s1878_s12 + $0x18] sm:$0xff] %v1286_v50 }
 0xba3   : > { %v1288_v52 = vpop.f32.mrf.mxu1 }
 0xba4   : > { %v1289_v53 = vadd.f32 %v1288_v52, %v1287_v51 }
 0xba5   : > { %v1290_v15 = vpop.f32.mrf.mxu1 }
 0xba6   : > { %1033 = vst [vmem:[%s1878_s12 + $0x20] sm:$0xff] %v1289_v53 }
 0xba7   : > { %v1291_v16 = vpop.f32.mrf.mxu1 }
 0xba8   : > { %v1292_v17 = vadd.f32 %v1291_v16, %v1290_v15 }
 0xba9   : > { %v1293_v18 = vpop.f32.mrf.mxu1 }
 0xbaa   : > { %1034 = vst [vmem:[%s1878_s12 + $0x28] sm:$0xff] %v1292_v17 }
 0xbab   : > { %v1294_v19 = vpop.f32.mrf.mxu1 }
 0xbac   : > { %v1295_v20 = vadd.f32 %v1294_v19, %v1293_v18 }
 0xbad   : > { %v1296_v21 = vpop.f32.mrf.mxu1 }
 0xbae   : > { %1035 = vst [vmem:[%s1878_s12 + $0x30] sm:$0xff] %v1295_v20 }
 0xbaf   : > { %v1297_v22 = vpop.f32.mrf.mxu1 }
 0xbb0   : > { %v1298_v23 = vadd.f32 %v1297_v22, %v1296_v21 }
 0xbb1   : > { %v1299_v24 = vpop.f32.mrf.mxu1 }
 0xbb2   : > { %1036 = vst [vmem:[%s1878_s12 + $0x38] sm:$0xff] %v1298_v23 }
 0xbb3   : > { %v1300_v25 = vpop.f32.mrf.mxu1 }
 0xbb4   : > { %v1301_v26 = vadd.f32 %v1300_v25, %v1299_v24 }
 0xbb5   : > { %v1302_v27 = vpop.f32.mrf.mxu1 }
 0xbb6   : > { %1037 = vst [vmem:[%s1878_s12 + $0x40] sm:$0xff] %v1301_v26 }
 0xbb7   : > { %v1303_v28 = vpop.f32.mrf.mxu1 }
 0xbb8   : > { %v1304_v29 = vadd.f32 %v1303_v28, %v1302_v27 }
 0xbb9   : > { %v1305_v30 = vpop.f32.mrf.mxu1 }
 0xbba   : > { %1038 = vst [vmem:[%s1878_s12 + $0x48] sm:$0xff] %v1304_v29 }
 0xbbb   : > { %v1306_v31 = vpop.f32.mrf.mxu1 }
 0xbbc   : > { %v1307_v32 = vadd.f32 %v1306_v31, %v1305_v30 }
 0xbbd   : > { %v1308_v33 = vpop.f32.mrf.mxu1 }
 0xbbe   : > { %1039 = vst [vmem:[%s1878_s12 + $0x50] sm:$0xff] %v1307_v32 }
 0xbbf   : > { %v1309_v34 = vpop.f32.mrf.mxu1 }
 0xbc0   : > { %v1310_v35 = vadd.f32 %v1309_v34, %v1308_v33 }
 0xbc1   : > { %v1311_v36 = vpop.f32.mrf.mxu1 }
 0xbc2   : > { %1040 = vst [vmem:[%s1878_s12 + $0x58] sm:$0xff] %v1310_v35 }
 0xbc3   : > { %v1312_v37 = vpop.f32.mrf.mxu1 }
 0xbc4   : > { %v1313_v38 = vadd.f32 %v1312_v37, %v1311_v36 }
 0xbc5   : > { %v1314_v39 = vpop.f32.mrf.mxu1 }
 0xbc6   : > { %1041 = vst [vmem:[%s1878_s12 + $0x60] sm:$0xff] %v1313_v38 }
 0xbc7   : > { %v1315_v40 = vpop.f32.mrf.mxu1 }
 0xbc8   : > { %v1316_v41 = vadd.f32 %v1315_v40, %v1314_v39 }
 0xbc9   : > { %v1317_v42 = vpop.f32.mrf.mxu1 }
 0xbca   : > { %1042 = vst [vmem:[%s1878_s12 + $0x68] sm:$0xff] %v1316_v41 }
 0xbcb   : > { %v1318_v43 = vpop.f32.mrf.mxu1 }
 0xbcc   : > { %v1319_v44 = vadd.f32 %v1318_v43, %v1317_v42 }
 0xbcd   : > { %v1320_v45 = vpop.f32.mrf.mxu1 }
 0xbce   : > { %1043 = vst [vmem:[%s1878_s12 + $0x70] sm:$0xff] %v1319_v44 }
 0xbcf   : > { %v1321_v46 = vpop.f32.mrf.mxu1 }
 0xbd0   : > { %v1322_v47 = vadd.f32 %v1321_v46, %v1320_v45 }
 0xbd2   : > { %1044 = vst [vmem:[%s1878_s12 + $0x78] sm:$0xff] %v1322_v47 }
 0xbd3   : > { %1531 = shalt.err (!%p1528_p5)
}
 0xbd4   : > { %s1532_s12 = scalar_lea.hbm %s2125_s16, 2048  ;;  %s1536_s13 = scalar_lea.hbm %s2176_s5, 4096 }
 0xbd5   : > { %p1533_p0 = scmp.ne.s32.totalorder %s2125_s16, %s1532_s12  ;;  %p1537_p7 = scmp.lt.s32.totalorder %s2125_s16, %s2176_s5 }
 0xbd6   : > { %p1538_p11 = scmp.lt.s32.totalorder %s1536_s13, %s1532_s12 }
 0xbd7   : > { %p1534_p4 = pnand %p1533_p0, %p2194_p1 }
 0xbd8   : > { %p1539_p10 = por %p1538_p11, %p1537_p7 }
 0xbd9   : > { %p1535_p8 = pneg %p1534_p4 }
 0xbdb   : > { %p1540_p2 = pnand %p1539_p10, %p1535_p8 }
 0xbdd   : > { %1543 = shalt.err (!%p1540_p2)
}
 0xbde   : > { %s1612_s23 = smov 128   ;;  %s1613_s26 = smov 8  }
 0xbdf   : > { %1334 = dma.vmem_to_hbm [thread:$0]  (%p2194_p1), %s2127_s15, 2048, %s2125_s16, %s1051_s10, %s1612_s23, %s1612_s23, %s1613_s26  }
 0xbe0 PF: > { %s1096_s14 = sand.u32 1, %s1582_s18   ;;  %p2195_p6 = scmp.ne.s32.totalorder %s2183_s25, 0 }
 0xbe1   : > { %p2196_p12 = scmp.ge.s32.totalorder %s1594_s21, 2  ;;  %s1097_s8 = scalar_lea.sflag [#allocation5], %s1096_s14 }
 0xbe3   : > { %p1349_p3 = pnand %p2196_p12, %p2195_p6 }
 0xbe5   : > { %p1350_p9 = pneg %p1349_p3 }
 0xbe7   : > { %1573 = dma.done.wait (%p1350_p9), %s1097_s8, 4096  }
 0xbe8   : > { %1575 = vsyncadd (%p1350_p9), %s1097_s8, 4294963200  ;;  %s1106_s22 = scalar_lea.sflag [#allocation11], %s1096_s14 }
 0xbe9   : > { %1577 = dma.done.wait (%p1350_p9), %s1106_s22, 2048  }
 0xbea   : > { %1579 = vsyncadd (%p1350_p9), %s1106_s22, 4294965248  ;;  %p23_p1 = scmp.ge.s32.totalorder %s1719_s17, 4   ;;  %s2197_s18 = smov %s1586_s19 }
 0xbeb   : > { %s2198_s19 = smov %s1590_s20  ;;  %s2199_s20 = smov %s1728_s28 }
 0xbec   : > { %s2200_s21 = smov %s1719_s17  ;;  %25 = sbr.rel (!%p23_p1) target bundleno = 8 (0x8), region = 125 }
 0xbf1   :  { %1111 = vsyncpa [#allocation4], 1 }
 0xbf2   :  { %1113 = vsyncpa [#allocation4 + $0x1], 1 }
 0xbf3   :  { %1114 = vsyncpa [#allocation7], 1 }
 0xbf4   :  { %1115 = vsyncpa [#allocation5], 1 }
 0xbf5   :  { %1117 = vsyncpa [#allocation5 + $0x1], 1 }
 0xbf6   :  { %1118 = vsyncpa [#allocation11], 1 }
 0xbf7   :  { %1120 = vsyncpa [#allocation11 + $0x1], 1 }

</bundles_post_ra>
